<compile_context>
chip_gen: v6e
topology: v6e:2x2x1
jax: 0.10.0
libtpu: 0.0.40
codegen_flags: <defaults>
</compile_context>

<pallas_src>
import jax
import jax.numpy as jnp
from jax.experimental import pallas as pl
from jax.experimental.pallas import tpu as pltpu


def _relu_conv1x1_kernel(x_ref, w_ref, o_ref):
    # x_ref: (Cin, HW)  pre-ReLU activation, f32, one batch element
    # w_ref: (Cout, Cin) weight, bf16
    # o_ref: (Cout, HW) output, f32
    x = jnp.maximum(x_ref[...], 0.0)          # fused ReLU in f32 (v5e VPU has no bf16)
    xb = x.astype(w_ref.dtype)                # bf16 operands into the MXU
    o_ref[...] = jnp.dot(
        w_ref[...], xb, preferred_element_type=jnp.float32
    ).astype(o_ref.dtype)


def relu_conv1x1(x_nchw: jax.Array, weight_oihw: jax.Array) -> jax.Array:
    """ReLU(x) followed by a 1x1 conv (stride 1, no bias).

    x_nchw:      [N, Cin, H, W]
    weight_oihw: [Cout, Cin, 1, 1]   (PyTorch Conv2d weight layout)
    returns:     [N, Cout, H, W]  (float32)
    """
    n, cin, h, w = x_nchw.shape
    cout = weight_oihw.shape[0]
    assert weight_oihw.shape == (cout, cin, 1, 1)
    hw = h * w

    # NCHW -> (N, Cin, H*W): free reshape, no relayout. 1x1 conv == W @ X.
    x_flat = x_nchw.reshape(n, cin, hw).astype(jnp.float32)

    # (Cout, Cin, 1, 1) -> (Cout, Cin), cast to bf16 (f32 accumulate in-kernel).
    w_mat = weight_oihw[:, :, 0, 0].astype(jnp.bfloat16)

    cost = pl.CostEstimate(
        flops=2 * n * cout * cin * hw,
        transcendentals=0,
        bytes_accessed=(x_flat.size * x_flat.dtype.itemsize
                        + w_mat.size * w_mat.dtype.itemsize
                        + n * cout * hw * 4),
    )

    out_flat = pl.pallas_call(
        _relu_conv1x1_kernel,
        out_shape=jax.ShapeDtypeStruct((n, cout, hw), jnp.float32),
        grid=(n,),
        in_specs=[
            # One batch element per grid step (leading dim squeezed).
            pl.BlockSpec((None, cin, hw), lambda i: (i, 0, 0)),
            # Full weight, resident across steps.
            pl.BlockSpec((cout, cin), lambda i: (0, 0)),
        ],
        out_specs=pl.BlockSpec((None, cout, hw), lambda i: (i, 0, 0)),
        compiler_params=pltpu.CompilerParams(
            dimension_semantics=("parallel",),  # shards over batch on v7x if N>1
        ),
        cost_estimate=cost,
    )(x_flat, w_mat)

    # (N, Cout, H*W) -> (N, Cout, H, W): free reshape, already NCHW order.
    return out_flat.reshape(n, cout, h, w)


if __name__ == "__main__":
    key = jax.random.PRNGKey(0)
    k_x, k_w = jax.random.split(key)

    # Shapes implied by the module: input [1, 1728, 7, 7], weight [128, 1728, 1, 1]
    x = jax.random.normal(k_x, (1, 1728, 7, 7), dtype=jnp.float32)
    # Deterministic synthetic weight (kaiming-ish scale, not a checkpoint load).
    weight = jax.random.normal(k_w, (128, 1728, 1, 1), dtype=jnp.float32) * 0.02

    out = relu_conv1x1(x, weight)
    out = jax.block_until_ready(out)

    # Sanity check against a plain-JAX f32 reference of the same math.
    # Tolerance accounts for bf16 operands with f32 accumulation over K=1728.
    x_relu = jnp.maximum(x, 0.0)
    ref = jnp.einsum(
        "nchw,oc->nohw", x_relu, weight[:, :, 0, 0],
        preferred_element_type=jnp.float32,
    )
    assert out.shape == (1, 128, 7, 7), out.shape
    assert jnp.allclose(out, ref, atol=1e-2, rtol=1e-2)

    print("KERNEL_OK")
</pallas_src>

<mosaic_0001>
module attributes {stable_mosaic.version = 11 : i64} {
  func.func @_relu_conv1x1_kernel(%arg0: i32, %arg1: memref<1x1728x49xf32, #tpu.memory_space<vmem>>, %arg2: memref<128x1728xbf16, #tpu.memory_space<vmem>>, %arg3: memref<1x128x49xf32, #tpu.memory_space<vmem>>) attributes {dimension_semantics = [#tpu.dimension_semantics<parallel>], iteration_bounds = array<i64: 1>, scalar_prefetch = 0 : i64, scratch_operands = 0 : i64, tpu.core_type = #tpu.core_type<tc>, window_params = [{transform_indices = @transform_0, window_bounds = array<i64: 1, 1728, 49>}, {pipeline_mode = #tpu.pipeline_mode<synchronous>, transform_indices = @transform_1, window_bounds = array<i64: 128, 1728>}, {transform_indices = @transform_2, window_bounds = array<i64: 1, 128, 49>}]} {
    %c0 = arith.constant 0 : index
    %c0_0 = arith.constant 0 : index
    %c0_1 = arith.constant 0 : index
    %0 = vector.load %arg1[%c0, %c0_0, %c0_1] : memref<1x1728x49xf32, #tpu.memory_space<vmem>>, vector<1x1728x49xf32>
    %1 = vector.shape_cast %0 : vector<1x1728x49xf32> to vector<1728x49xf32>
    %cst = arith.constant 0.000000e+00 : f32
    %2 = vector.broadcast %cst : f32 to vector<1728x49xf32>
    %3 = arith.maximumf %1, %2 : vector<1728x49xf32>
    %4 = arith.truncf %3 : vector<1728x49xf32> to vector<1728x49xbf16>
    %c0_2 = arith.constant 0 : index
    %c0_3 = arith.constant 0 : index
    %5 = vector.load %arg2[%c0_2, %c0_3] : memref<128x1728xbf16, #tpu.memory_space<vmem>>, vector<128x1728xbf16>
    %cst_4 = arith.constant dense<0.000000e+00> : vector<128x49xf32>
    %6 = tpu.matmul %5, %4, %cst_4 {dimension_numbers = #tpu.dot_dimension_numbers<[1], [0], [0], [1], [0, 0, 1, 1], [], []>} : vector<128x1728xbf16>, vector<1728x49xbf16>, vector<128x49xf32> -> vector<128x49xf32>
    %c0_5 = arith.constant 0 : index
    %c0_6 = arith.constant 0 : index
    %c0_7 = arith.constant 0 : index
    %7 = vector.load %arg3[%c0_5, %c0_6, %c0_7] : memref<1x128x49xf32, #tpu.memory_space<vmem>>, vector<1x128x49xf32>
    %8 = vector.shape_cast %7 : vector<1x128x49xf32> to vector<128x49xf32>
    %9 = vector.shape_cast %6 : vector<128x49xf32> to vector<1x128x49xf32>
    tpu.vector_store %arg3[%c0_5, %c0_6, %c0_7], %9 {strides = array<i32>} : memref<1x128x49xf32, #tpu.memory_space<vmem>>, vector<1x128x49xf32>,
    return
  }
  func.func @transform_0(%arg0: i32) -> (i32, i32, i32) {
    %c0_i32 = arith.constant 0 : i32
    %c0_i32_0 = arith.constant 0 : i32
    %c0_i32_1 = arith.constant 0 : i32
    return %arg0, %c0_i32, %c0_i32_0 : i32, i32, i32
  }
  func.func @transform_1(%arg0: i32) -> (i32, i32) {
    %c0_i32 = arith.constant 0 : i32
    %c0_i32_0 = arith.constant 0 : i32
    %c0_i32_1 = arith.constant 0 : i32
    return %c0_i32, %c0_i32_0 : i32, i32
  }
  func.func @transform_2(%arg0: i32) -> (i32, i32, i32) {
    %c0_i32 = arith.constant 0 : i32
    %c0_i32_0 = arith.constant 0 : i32
    %c0_i32_1 = arith.constant 0 : i32
    return %arg0, %c0_i32, %c0_i32_0 : i32, i32, i32
  }
}

</mosaic_0001>

<bundles_post_ra>
// kernel: tpu_custom_call.1
= control target key start
LH: loop header
LB: loop body
LE: loop exit
PB: predicated region body
PF: predicated region fallthrough
CT: control target
= control target key end

     0   :  { %vm1216_vm0 = vcmask 523264   ;;  %vm1920_vm1 = vcmask 400384   ;;  %s3861_s0 = inlined_call_operand.vmem [shape: f32[1,1728,49], index: 0, kind: input, shape index: {}]   ;;  %s3862_s1 = inlined_call_operand.vmem [shape: bf16[128,1728], index: 1, kind: input, shape index: {}]   ;;  %s3863_s2 = inlined_call_operand.vmem [shape: f32[1,128,49], index: 2, kind: output, shape index: {}]  }
   0x1   :  { %v42_v0 = vld [vmem:[%s3861_s0 + $0xf0] sm:$0xff]  ;;  %v43_v1 = vld [vmem:[%s3861_s0 + $0xf8] sm:$0xff]  ;;  %v40_v7 = vld [vmem:[%s3861_s0 + $0xe0] sm:$0xff] }
   0x2   :  { %v26_v2 = vld [vmem:[%s3861_s0 + $0x70] sm:$0xff]  ;;  %v258_v3 = vmax.f32 %v42_v0, 0.0  ;;  %v259_v4 = vmax.f32 %v43_v1, 0.0  ;;  %v27_v5 = vld [vmem:[%s3861_s0 + $0x78] sm:$0xff]  ;;  %v41_v8 = vld [vmem:[%s3861_s0 + $0xe8] sm:$0xff]  ;;  %v256_v10 = vmax.f32 %v40_v7, 0.0 }
   0x3   :  { %v242_v6 = vmax.f32 %v26_v2, 0.0  ;;  %v243_v9 = vmax.f32 %v27_v5, 0.0  ;;  %v257_v11 = vmax.f32 %v41_v8, 0.0  ;;  %v24_v12 = vld [vmem:[%s3861_s0 + $0x60] sm:$0xff]  ;;  %v25_v13 = vld [vmem:[%s3861_s0 + $0x68] sm:$0xff]  ;;  %v38_v14 = vld [vmem:[%s3861_s0 + $0xd0] sm:$0xff] }
   0x4   :  { %v459_v15 = vpack.c.bf16 %v259_v4, %v258_v3  ;;  %v240_v16 = vmax.f32 %v24_v12, 0.0  ;;  %v241_v17 = vmax.f32 %v25_v13, 0.0  ;;  %v39_v18 = vld [vmem:[%s3861_s0 + $0xd8] sm:$0xff]  ;;  %v254_v19 = vmax.f32 %v38_v14, 0.0  ;;  %v22_v20 = vld [vmem:[%s3861_s0 + $0x50] sm:$0xff]  ;;  %v36_v25 = vld [vmem:[%s3861_s0 + $0xc0] sm:$0xff] }
   0x5   :  { %v23_v21 = vld [vmem:[%s3861_s0 + $0x58] sm:$0xff]  ;;  %v451_v22 = vpack.c.bf16 %v243_v9, %v242_v6  ;;  %v458_v23 = vpack.c.bf16 %v257_v11, %v256_v10  ;;  %v255_v24 = vmax.f32 %v39_v18, 0.0  ;;  %v37_v26 = vld [vmem:[%s3861_s0 + $0xc8] sm:$0xff]  ;;  %v238_v28 = vmax.f32 %v22_v20, 0.0  ;;  %v20_v33 = vld [vmem:[%s3861_s0 + $0x40] sm:$0xff] }
   0x6   :  { %2445 = vmatprep.subr.bf16.mxu1 %v459_v15  ;;  %2061 = vmatprep.subr.bf16.mxu0 %v459_v15  ;;  %v450_v27 = vpack.c.bf16 %v241_v17, %v240_v16  ;;  %v239_v29 = vmax.f32 %v23_v21, 0.0  ;;  %v252_v31 = vmax.f32 %v36_v25, 0.0  ;;  %v253_v32 = vmax.f32 %v37_v26, 0.0  ;;  %v21_v34 = vld [vmem:[%s3861_s0 + $0x48] sm:$0xff]  ;;  %v34_v35 = vld [vmem:[%s3861_s0 + $0xb0] sm:$0xff]  ;;  %v35_v36 = vld [vmem:[%s3861_s0 + $0xb8] sm:$0xff] }
   0x7   :  { %2453 = vmatpush3.bf16.msra.mxu1 %v451_v22  ;;  %2062 = vmatpush3.bf16.msra.mxu0 %v451_v22  ;;  %v457_v30 = vpack.c.bf16 %v255_v24, %v254_v19  ;;  %v236_v38 = vmax.f32 %v20_v33, 0.0  ;;  %v237_v39 = vmax.f32 %v21_v34, 0.0  ;;  %v18_v40 = vld [vmem:[%s3861_s0 + $0x30] sm:$0xff]  ;;  %v19_v41 = vld [vmem:[%s3861_s0 + $0x38] sm:$0xff]  ;;  %v250_v43 = vmax.f32 %v34_v35, 0.0  ;;  %v32_v45 = vld [vmem:[%s3861_s0 + $0xa0] sm:$0xff] }
   0x8   :  { %2446 = vmatprep.subr.bf16.mxu1 %v458_v23  ;;  %2063 = vmatprep.subr.bf16.mxu0 %v458_v23  ;;  %v449_v37 = vpack.c.bf16 %v239_v29, %v238_v28  ;;  %v456_v42 = vpack.c.bf16 %v253_v32, %v252_v31  ;;  %v251_v44 = vmax.f32 %v35_v36, 0.0  ;;  %v33_v46 = vld [vmem:[%s3861_s0 + $0xa8] sm:$0xff]  ;;  %v2464_v47 = vld [vmem:[%s3862_s1 + $0x1c4] ss:$56 sps:$4 sm:$0xff]   ;;  %v234_v50 = vmax.f32 %v18_v40, 0.0  ;;  %v30_v57 = vld [vmem:[%s3861_s0 + $0x90] sm:$0xff] }
   0x9   :  { %v2467_v48 = vld [vmem:[%s3862_s1 + $0x4] ss:$56 sps:$4 sm:$0xff]   ;;  %v448_v49 = vpack.c.bf16 %v237_v39, %v236_v38  ;;  %v235_v51 = vmax.f32 %v19_v41, 0.0  ;;  %v248_v53 = vmax.f32 %v32_v45, 0.0  ;;  %v249_v54 = vmax.f32 %v33_v46, 0.0  ;;  %v17_v56 = vld [vmem:[%s3861_s0 + $0x28] sm:$0xff]  ;;  %1305 = vmatprep.mubr.bf16.mxu1 %v2464_v47 }
   0xa   :  { %v455_v52 = vpack.c.bf16 %v251_v44, %v250_v43  ;;  %v16_v55 = vld [vmem:[%s3861_s0 + $0x20] sm:$0xff]  ;;  %v31_v58 = vld [vmem:[%s3861_s0 + $0x98] sm:$0xff]  ;;  %1273 = vmatprep.mubr.bf16.mxu0 %v2467_v48  ;;  %v233_v61 = vmax.f32 %v17_v56, 0.0  ;;  %v14_v62 = vld [vmem:[%s3861_s0 + $0x10] sm:$0xff]  ;;  %v246_v1 = vmax.f32 %v30_v57, 0.0 }
   0xb   :  { %2454 = vmatpush3.bf16.msra.mxu1 %v450_v27  ;;  %2064 = vmatpush3.bf16.msra.mxu0 %v450_v27  ;;  %v447_v59 = vpack.c.bf16 %v235_v51, %v234_v50  ;;  %v232_v60 = vmax.f32 %v16_v55, 0.0  ;;  %v15_v63 = vld [vmem:[%s3861_s0 + $0x18] sm:$0xff]  ;;  %v454_v0 = vpack.c.bf16 %v249_v54, %v248_v53  ;;  %v247_v2 = vmax.f32 %v31_v58, 0.0  ;;  %v28_v3 = vld [vmem:[%s3861_s0 + $0x80] sm:$0xff]  ;;  %v29_v4 = vld [vmem:[%s3861_s0 + $0x88] sm:$0xff] }
   0xc   :  { %2447 = vmatprep.subr.bf16.mxu1 %v457_v30  ;;  %2065 = vmatprep.subr.bf16.mxu0 %v457_v30  ;;  %v230_v6 = vmax.f32 %v14_v62, 0.0  ;;  %v231_v7 = vmax.f32 %v15_v63, 0.0  ;;  %v12_v8 = vld [vmem:[%s3861_s0] sm:$0xff]  ;;  %v13_v9 = vld [vmem:[%s3861_s0 + $0x8] sm:$0xff]  ;;  %v244_v11 = vmax.f32 %v28_v3, 0.0  ;;  %v245_v12 = vmax.f32 %v29_v4, 0.0 }
   0xd   :  { %v446_v5 = vpack.c.bf16 %v233_v61, %v232_v60  ;;  %v453_v10 = vpack.c.bf16 %v247_v2, %v246_v1  ;;  %v74_v13 = vld [vmem:[%s3861_s0 + $0x1f0] sm:$0xff]  ;;  %v75_v14 = vld [vmem:[%s3861_s0 + $0x1f8] sm:$0xff]  ;;  %v228_v17 = vmax.f32 %v12_v8, 0.0  ;;  %v229_v18 = vmax.f32 %v13_v9, 0.0  ;;  %v72_v26 = vld [vmem:[%s3861_s0 + $0x1e0] sm:$0xff] }
   0xe   :  { %v106_v15 = vld [vmem:[%s3861_s0 + $0x2f0] sm:$0xff]  ;;  %v107_v16 = vld [vmem:[%s3861_s0 + $0x2f8] sm:$0xff]  ;;  %v445_v22 = vpack.c.bf16 %v231_v7, %v230_v6  ;;  %v290_v23 = vmax.f32 %v74_v13, 0.0  ;;  %v291_v24 = vmax.f32 %v75_v14, 0.0  ;;  %v73_v27 = vld [vmem:[%s3861_s0 + $0x1e8] sm:$0xff]  ;;  %v452_v28 = vpack.c.bf16 %v245_v12, %v244_v11 }
   0xf   :  { %2455 = vmatpush3.bf16.msra.mxu1 %v449_v37  ;;  %2066 = vmatpush3.bf16.msra.mxu0 %v449_v37  ;;  %v58_v19 = vld [vmem:[%s3861_s0 + $0x170] sm:$0xff]  ;;  %v59_v20 = vld [vmem:[%s3861_s0 + $0x178] sm:$0xff]  ;;  %v322_v29 = vmax.f32 %v106_v15, 0.0  ;;  %v323_v30 = vmax.f32 %v107_v16, 0.0  ;;  %v104_v31 = vld [vmem:[%s3861_s0 + $0x2e0] sm:$0xff]  ;;  %v444_v33 = vpack.c.bf16 %v229_v18, %v228_v17  ;;  %v288_v40 = vmax.f32 %v72_v26, 0.0 }
  0x10   :  { %2448 = vmatprep.subr.bf16.mxu1 %v456_v42  ;;  %2067 = vmatprep.subr.bf16.mxu0 %v456_v42  ;;  %v90_v21 = vld [vmem:[%s3861_s0 + $0x270] sm:$0xff]  ;;  %v91_v25 = vld [vmem:[%s3861_s0 + $0x278] sm:$0xff]  ;;  %v105_v32 = vld [vmem:[%s3861_s0 + $0x2e8] sm:$0xff]  ;;  %v274_v34 = vmax.f32 %v58_v19, 0.0  ;;  %v275_v35 = vmax.f32 %v59_v20, 0.0  ;;  %v475_v37 = vpack.c.bf16 %v291_v24, %v290_v23  ;;  %v289_v46 = vmax.f32 %v73_v27, 0.0 }
  0x11   :  { %v56_v36 = vld [vmem:[%s3861_s0 + $0x160] sm:$0xff]  ;;  %v306_v38 = vmax.f32 %v90_v21, 0.0  ;;  %v307_v39 = vmax.f32 %v91_v25, 0.0  ;;  %v57_v41 = vld [vmem:[%s3861_s0 + $0x168] sm:$0xff]  ;;  %v491_v45 = vpack.c.bf16 %v323_v30, %v322_v29  ;;  %v320_v47 = vmax.f32 %v104_v31, 0.0  ;;  %v71_v50 = vld [vmem:[%s3861_s0 + $0x1d8] sm:$0xff] }
  0x12   :  { %v88_v42 = vld [vmem:[%s3861_s0 + $0x260] sm:$0xff]  ;;  %v89_v43 = vld [vmem:[%s3861_s0 + $0x268] sm:$0xff]  ;;  %v321_v48 = vmax.f32 %v105_v32, 0.0  ;;  %v102_v53 = vld [vmem:[%s3861_s0 + $0x2d0] sm:$0xff]  ;;  %v273_v55 = vmax.f32 %v57_v41, 0.0  ;;  %v467_v61 = vpack.c.bf16 %v275_v35, %v274_v34  ;;  %v287_v2 = vmax.f32 %v71_v50, 0.0 }
  0x13   :  { %2456 = vmatpush3.bf16.msra.mxu1 %v448_v49  ;;  %2068 = vmatpush3.bf16.msra.mxu0 %v448_v49  ;;  %v2462_v44 = vld [vmem:[%s3862_s1 + $0x1c0] ss:$56 sps:$4 sm:$0xff]   ;;  %v70_v49 = vld [vmem:[%s3861_s0 + $0x1d0] sm:$0xff]  ;;  %v304_v56 = vmax.f32 %v88_v42, 0.0  ;;  %v305_v57 = vmax.f32 %v89_v43, 0.0  ;;  %v483_v62 = vpack.c.bf16 %v307_v39, %v306_v38  ;;  %v474_v6 = vpack.c.bf16 %v289_v46, %v288_v40  ;;  %v101_v11 = vld [vmem:[%s3861_s0 + $0x2c8] sm:$0xff] }
  0x14   :  { %2449 = vmatprep.subr.bf16.mxu1 %v455_v52  ;;  %2069 = vmatprep.subr.bf16.mxu0 %v455_v52  ;;  %v2465_v51 = vld [vmem:[%s3862_s1] ss:$56 sps:$4 sm:$0xff]   ;;  %v272_v52 = vmax.f32 %v56_v36, 0.0  ;;  %v54_v58 = vld [vmem:[%s3861_s0 + $0x150] sm:$0xff]  ;;  %v286_v1 = vmax.f32 %v70_v49, 0.0  ;;  %v490_v7 = vpack.c.bf16 %v321_v48, %v320_v47  ;;  %v318_v8 = vmax.f32 %v102_v53, 0.0 }
  0x15   :  { %v103_v54 = vld [vmem:[%s3861_s0 + $0x2d8] sm:$0xff]  ;;  %v86_v60 = vld [vmem:[%s3861_s0 + $0x250] sm:$0xff]  ;;  %v68_v4 = vld [vmem:[%s3861_s0 + $0x1c0] sm:$0xff]  ;;  %v482_v13 = vpack.c.bf16 %v305_v57, %v304_v56  ;;  %v270_v14 = vmax.f32 %v54_v58, 0.0 }
  0x16   :  { %v2468_v63 = vld [vmem:[%s3862_s1 + $0x234] ss:$56 sps:$4 sm:$0xff]   ;;  %v87_v3 = vld [vmem:[%s3861_s0 + $0x258] sm:$0xff]  ;;  %v319_v9 = vmax.f32 %v103_v54, 0.0  ;;  %v466_v12 = vpack.c.bf16 %v273_v55, %v272_v52  ;;  %v52_v16 = vld [vmem:[%s3861_s0 + $0x140] sm:$0xff]  ;;  %v473_v17 = vpack.c.bf16 %v287_v2, %v286_v1  ;;  %v302_v18 = vmax.f32 %v86_v60, 0.0 }
  0x17   :  { %2457 = vmatpush3.bf16.msra.mxu1 %v447_v59  ;;  %2070 = vmatpush3.bf16.msra.mxu0 %v447_v59  ;;  %v55_v59 = vld [vmem:[%s3861_s0 + $0x158] sm:$0xff]  ;;  %v303_v19 = vmax.f32 %v87_v3, 0.0  ;;  %v284_v20 = vmax.f32 %v68_v4, 0.0  ;;  %v53_v21 = vld [vmem:[%s3861_s0 + $0x148] sm:$0xff]  ;;  %v66_v29 = vld [vmem:[%s3861_s0 + $0x1b0] sm:$0xff]  ;;  %v268_v32 = vmax.f32 %v52_v16, 0.0 }
  0x18   :  { %2450 = vmatprep.subr.bf16.mxu1 %v454_v0  ;;  %2071 = vmatprep.subr.bf16.mxu0 %v454_v0  ;;  %v2470_v0 = vld [vmem:[%s3862_s1 + $0x74] ss:$56 sps:$4 sm:$0xff]   ;;  %v271_v15 = vmax.f32 %v55_v59, 0.0  ;;  %v2472_v24 = vld [vmem:[%s3862_s1 + $0x230] ss:$56 sps:$4 sm:$0xff]   ;;  %v489_v25 = vpack.c.bf16 %v319_v9, %v318_v8  ;;  %v67_v30 = vld [vmem:[%s3861_s0 + $0x1b8] sm:$0xff] }
  0x19   :  { %v85_v23 = vld [vmem:[%s3861_s0 + $0x248] sm:$0xff]  ;;  %v99_v34 = vld [vmem:[%s3861_s0 + $0x2b8] sm:$0xff]  ;;  %v269_v35 = vmax.f32 %v53_v21, 0.0  ;;  %v50_v38 = vld [vmem:[%s3861_s0 + $0x130] sm:$0xff]  ;;  %v481_v42 = vpack.c.bf16 %v303_v19, %v302_v18  ;;  %v283_v46 = vmax.f32 %v67_v30, 0.0 }
  0x1a   :  { %v2473_v31 = vld [vmem:[%s3862_s1 + $0x70] ss:$56 sps:$4 sm:$0xff]   ;;  %v51_v39 = vld [vmem:[%s3861_s0 + $0x138] sm:$0xff]  ;;  %v465_v41 = vpack.c.bf16 %v271_v15, %v270_v14  ;;  %v64_v48 = vld [vmem:[%s3861_s0 + $0x1a0] sm:$0xff]  ;;  %v315_v53 = vmax.f32 %v99_v34, 0.0  ;;  %v266_v58 = vmax.f32 %v50_v38, 0.0 }
  0x1b   :  { %2458 = vmatpush3.bf16.msra.mxu1 %v446_v5  ;;  %2072 = vmatpush3.bf16.msra.mxu0 %v446_v5  ;;  %v69_v5 = vld [vmem:[%s3861_s0 + $0x1c8] sm:$0xff]  ;;  %v82_v40 = vld [vmem:[%s3861_s0 + $0x230] sm:$0xff]  ;;  %v2474_v43 = vld [vmem:[%s3862_s1 + $0x2a4] ss:$56 sps:$4 sm:$0xff]   ;;  %v464_v56 = vpack.c.bf16 %v269_v35, %v268_v32  ;;  %v267_v59 = vmax.f32 %v51_v39, 0.0 }
  0x1c   :  { %2451 = vmatprep.subr.bf16.mxu1 %v453_v10  ;;  %2073 = vmatprep.subr.bf16.mxu0 %v453_v10  ;;  %v100_v10 = vld [vmem:[%s3861_s0 + $0x2c0] sm:$0xff]  ;;  %v285_v26 = vmax.f32 %v69_v5, 0.0  ;;  %v83_v47 = vld [vmem:[%s3861_s0 + $0x238] sm:$0xff]  ;;  %v65_v49 = vld [vmem:[%s3861_s0 + $0x1a8] sm:$0xff] }
  0x1d   :  { %v316_v27 = vmax.f32 %v100_v10, 0.0  ;;  %v96_v54 = vld [vmem:[%s3861_s0 + $0x2a0] sm:$0xff]  ;;  %v97_v55 = vld [vmem:[%s3861_s0 + $0x2a8] sm:$0xff]  ;;  %v62_v10 = vld [vmem:[%s3861_s0 + $0x190] sm:$0xff]  ;;  %v463_v19 = vpack.c.bf16 %v267_v59, %v266_v58 }
  0x1e   :  { %v472_v50 = vpack.c.bf16 %v285_v26, %v284_v20  ;;  %v48_v60 = vld [vmem:[%s3861_s0 + $0x120] sm:$0xff]  ;;  %v49_v1 = vld [vmem:[%s3861_s0 + $0x128] sm:$0xff]  ;;  %v312_v8 = vmax.f32 %v96_v54, 0.0  ;;  %v313_v9 = vmax.f32 %v97_v55, 0.0  ;;  %v46_v18 = vld [vmem:[%s3861_s0 + $0x110] sm:$0xff] }
  0x1f   :  { %2459 = vmatpush3.bf16.msra.mxu1 %v445_v22  ;;  %2074 = vmatpush3.bf16.msra.mxu0 %v445_v22  ;;  %v84_v22 = vld [vmem:[%s3861_s0 + $0x240] sm:$0xff]  ;;  %v81_v3 = vld [vmem:[%s3861_s0 + $0x228] sm:$0xff]  ;;  %v264_v14 = vmax.f32 %v48_v60, 0.0  ;;  %v265_v15 = vmax.f32 %v49_v1, 0.0  ;;  %v78_v26 = vld [vmem:[%s3861_s0 + $0x210] sm:$0xff]  ;;  %v262_v39 = vmax.f32 %v46_v18, 0.0 }
  0x20   :  { %2452 = vmatprep.subr.bf16.mxu1 %v452_v28  ;;  %2075 = vmatprep.subr.bf16.mxu0 %v452_v28  ;;  %v317_v28 = vmax.f32 %v101_v11, 0.0  ;;  %v300_v36 = vmax.f32 %v84_v22, 0.0  ;;  %v80_v2 = vld [vmem:[%s3861_s0 + $0x220] sm:$0xff]  ;;  %v63_v11 = vld [vmem:[%s3861_s0 + $0x198] sm:$0xff]  ;;  %v2480_v21 = vld [vmem:[%s3862_s1 + $0x314] ss:$56 sps:$4 sm:$0xff]  }
  0x21   :  { %v2478_v4 = vld [vmem:[%s3862_s1 + $0x2a0] ss:$56 sps:$4 sm:$0xff]   ;;  %v296_v16 = vmax.f32 %v80_v2, 0.0  ;;  %v2482_v22 = vld [vmem:[%s3862_s1 + $0x154] ss:$56 sps:$4 sm:$0xff]  }
  0x22   :  { %v2479_v5 = vld [vmem:[%s3862_s1 + $0xe0] ss:$56 sps:$4 sm:$0xff]   ;;  %v2484_v54 = vld [vmem:[%s3862_s1 + $0x310] ss:$56 sps:$4 sm:$0xff]   ;;  %v2488_v1 = vld [vmem:[%s3862_s1 + $0xc] ss:$56 sps:$4 sm:$0xff]  }
  0x23   :  { %2460 = vmatpush3.bf16.msra.mxu1 %v444_v33  ;;  %2076 = vmatpush3.bf16.msra.mxu0 %v444_v33  ;;  %v98_v33 = vld [vmem:[%s3861_s0 + $0x2b0] sm:$0xff]  ;;  %v60_v32 = vld [vmem:[%s3861_s0 + $0x180] sm:$0xff]  ;;  %v169_v18 = vld [vmem:[%s3861_s0 + $0x4e8] sm:$0xff] }
  0x24   :  { %2125 = vmatprep.subr.bf16.mxu1 %v475_v37  ;;  %2189 = vmatprep.subr.bf16.mxu0 %v491_v45  ;;  %v301_v37 = vmax.f32 %v85_v23, 0.0  ;;  %v282_v45 = vmax.f32 %v66_v29, 0.0  ;;  %v314_v52 = vmax.f32 %v98_v33, 0.0  ;;  %v278_v23 = vmax.f32 %v62_v10, 0.0  ;;  %v61_v33 = vld [vmem:[%s3861_s0 + $0x188] sm:$0xff]  ;;  %v2961_v34 = vld [vmem:[%s3861_s0 + $0x100] sm:$0xff] }
  0x25   :  { %v92_v35 = vld [vmem:[%s3861_s0 + $0x280] sm:$0xff]  ;;  %v170_v55 = vld [vmem:[%s3861_s0 + $0x4f0] sm:$0xff]  ;;  %v260_v59 = vmax.f32 %v2961_v34, 0.0 }
  0x26   :  { %1306 = vmatmul.mubr.bf16.vlgmr.msra.gmra.mxu1 %v2462_v44  ;;  %1274 = vmatmul.mubr.bf16.vlgmr.msra.gmra.mxu0 %v2465_v51  ;;  %v2476_v44 = vld [vmem:[%s3862_s1 + $0xe4] ss:$56 sps:$4 sm:$0xff]   ;;  %v488_v51 = vpack.c.bf16 %v317_v28, %v316_v27  ;;  %v480_v57 = vpack.c.bf16 %v301_v37, %v300_v36  ;;  %v486_v28 = vpack.c.bf16 %v313_v9, %v312_v8  ;;  %v93_v36 = vld [vmem:[%s3861_s0 + $0x288] sm:$0xff]  ;;  %v386_v8 = vmax.f32 %v170_v55, 0.0  ;;  %v154_v10 = vld [vmem:[%s3861_s0 + $0x470] sm:$0xff] }
  0x27   :  { %2126 = vmatpush3.bf16.msra.mxu1 %v467_v61  ;;  %2190 = vmatpush3.bf16.msra.mxu0 %v483_v62  ;;  %v471_v61 = vpack.c.bf16 %v283_v46, %v282_v45  ;;  %v298_v62 = vmax.f32 %v82_v40, 0.0  ;;  %v462_v37 = vpack.c.bf16 %v265_v15, %v264_v14  ;;  %v276_v45 = vmax.f32 %v60_v32, 0.0  ;;  %v76_v46 = vld [vmem:[%s3861_s0 + $0x200] sm:$0xff]  ;;  %v2491_v2 = vld [vmem:[%s3862_s1 + $0x14] ss:$56 sps:$4 sm:$0xff]   ;;  %v135_v32 = vld [vmem:[%s3861_s0 + $0x3d8] sm:$0xff] }
  0x28   :  { %2127 = vmatprep.subr.bf16.mxu1 %v474_v6  ;;  %2191 = vmatprep.subr.bf16.mxu0 %v490_v7  ;;  %v487_v6 = vpack.c.bf16 %v315_v53, %v314_v52  ;;  %v281_v7 = vmax.f32 %v65_v49, 0.0  ;;  %v309_v52 = vmax.f32 %v93_v36, 0.0  ;;  %v139_v53 = vld [vmem:[%s3861_s0 + $0x3f8] sm:$0xff]  ;;  %v166_v36 = vld [vmem:[%s3861_s0 + $0x4d0] sm:$0xff] }
  0x29   :  { %1313 = vmatprep.mubr.bf16.mxu1 %v2468_v63  ;;  %1281 = vmatprep.mubr.bf16.mxu0 %v2470_v0  ;;  %v299_v63 = vmax.f32 %v83_v47, 0.0  ;;  %v280_v0 = vmax.f32 %v64_v48, 0.0  ;;  %v77_v47 = vld [vmem:[%s3861_s0 + $0x208] sm:$0xff]  ;;  %v138_v48 = vld [vmem:[%s3861_s0 + $0x3f0] sm:$0xff] }
  0x2b   :  { %2128 = vmatpush3.bf16.msra.mxu1 %v466_v12  ;;  %2192 = vmatpush3.bf16.msra.mxu0 %v482_v13  ;;  %v94_v12 = vld [vmem:[%s3861_s0 + $0x290] sm:$0xff]  ;;  %v95_v13 = vld [vmem:[%s3861_s0 + $0x298] sm:$0xff]  ;;  %v479_v20 = vpack.c.bf16 %v299_v63, %v298_v62  ;;  %v470_v27 = vpack.c.bf16 %v281_v7, %v280_v0  ;;  %v293_v0 = vmax.f32 %v77_v47, 0.0 }
  0x2c   :  { %2129 = vmatprep.subr.bf16.mxu1 %v473_v17  ;;  %2193 = vmatprep.subr.bf16.mxu0 %v489_v25  ;;  %v297_v17 = vmax.f32 %v81_v3, 0.0  ;;  %v47_v25 = vld [vmem:[%s3861_s0 + $0x118] sm:$0xff]  ;;  %v310_v29 = vmax.f32 %v94_v12, 0.0  ;;  %v311_v30 = vmax.f32 %v95_v13, 0.0  ;;  %v122_v62 = vld [vmem:[%s3861_s0 + $0x370] sm:$0xff]  ;;  %v354_v3 = vmax.f32 %v138_v48, 0.0 }
  0x2d   :  { %v263_v40 = vmax.f32 %v47_v25, 0.0  ;;  %v136_v12 = vld [vmem:[%s3861_s0 + $0x3e0] sm:$0xff]  ;;  %v137_v13 = vld [vmem:[%s3861_s0 + $0x3e8] sm:$0xff]  ;;  %v338_v14 = vmax.f32 %v122_v62, 0.0  ;;  %v351_v48 = vmax.f32 %v135_v32, 0.0 }
  0x2e   :  { %1314 = vmatmul.mubr.bf16.gmra.mxu1 %v2472_v24  ;;  %1282 = vmatmul.mubr.bf16.gmra.mxu0 %v2473_v31  ;;  %v279_v24 = vmax.f32 %v63_v11, 0.0  ;;  %v79_v31 = vld [vmem:[%s3861_s0 + $0x218] sm:$0xff]  ;;  %v478_v38 = vpack.c.bf16 %v297_v17, %v296_v16  ;;  %v485_v49 = vpack.c.bf16 %v311_v30, %v310_v29  ;;  %v120_v16 = vld [vmem:[%s3861_s0 + $0x360] sm:$0xff]  ;;  %v352_v30 = vmax.f32 %v136_v12, 0.0 }
  0x2f   :  { %2130 = vmatpush3.bf16.msra.mxu1 %v465_v41  ;;  %2194 = vmatpush3.bf16.msra.mxu0 %v481_v42  ;;  %v45_v41 = vld [vmem:[%s3861_s0 + $0x108] sm:$0xff]  ;;  %v461_v58 = vpack.c.bf16 %v263_v40, %v262_v39  ;;  %v155_v11 = vld [vmem:[%s3861_s0 + $0x478] sm:$0xff]  ;;  %v168_v17 = vld [vmem:[%s3861_s0 + $0x4e0] sm:$0xff] }
  0x30   :  { %2131 = vmatprep.subr.bf16.mxu1 %v472_v50  ;;  %2195 = vmatprep.subr.bf16.mxu0 %v488_v51  ;;  %v469_v42 = vpack.c.bf16 %v279_v24, %v278_v23  ;;  %v277_v50 = vmax.f32 %v61_v33, 0.0  ;;  %v308_v51 = vmax.f32 %v92_v35, 0.0  ;;  %v261_v60 = vmax.f32 %v45_v41, 0.0  ;;  %v152_v23 = vld [vmem:[%s3861_s0 + $0x460] sm:$0xff]  ;;  %v153_v24 = vld [vmem:[%s3861_s0 + $0x468] sm:$0xff] }
  0x31   :  { %1321 = vmatprep.mubr.bf16.mxu1 %v2474_v43  ;;  %1289 = vmatprep.mubr.bf16.mxu0 %v2476_v44  ;;  %v294_v43 = vmax.f32 %v78_v26, 0.0  ;;  %v295_v44 = vmax.f32 %v79_v31, 0.0  ;;  %v2486_v25 = vld [vmem:[%s3862_s1 + $0x8] ss:$56 sps:$4 sm:$0xff]   ;;  %v371_v29 = vmax.f32 %v155_v11, 0.0  ;;  %v134_v31 = vld [vmem:[%s3861_s0 + $0x3d0] sm:$0xff] }
  0x32   :  { %v484_v7 = vpack.c.bf16 %v309_v52, %v308_v51  ;;  %v2489_v26 = vld [vmem:[%s3862_s1 + $0x10] ss:$56 sps:$4 sm:$0xff]   ;;  %v353_v33 = vmax.f32 %v137_v13, 0.0  ;;  %v384_v34 = vmax.f32 %v168_v17, 0.0  ;;  %v385_v35 = vmax.f32 %v169_v18, 0.0 }
  0x33   :  { %2132 = vmatpush3.bf16.msra.mxu1 %v464_v56  ;;  %2196 = vmatpush3.bf16.msra.mxu0 %v480_v57  ;;  %v171_v56 = vld [vmem:[%s3861_s0 + $0x4f8] sm:$0xff]  ;;  %v2485_v57 = vld [vmem:[%s3862_s1 + $0x150] ss:$56 sps:$4 sm:$0xff]   ;;  %v477_v63 = vpack.c.bf16 %v295_v44, %v294_v43  ;;  %v336_v41 = vmax.f32 %v120_v16, 0.0  ;;  %v368_v43 = vmax.f32 %v152_v23, 0.0  ;;  %v369_v44 = vmax.f32 %v153_v24, 0.0 }
  0x34   :  { %2133 = vmatprep.subr.bf16.mxu1 %v471_v61  ;;  %2197 = vmatprep.subr.bf16.mxu0 %v487_v6  ;;  %v292_v61 = vmax.f32 %v76_v46, 0.0  ;;  %v468_v6 = vpack.c.bf16 %v277_v50, %v276_v45  ;;  %v387_v9 = vmax.f32 %v171_v56, 0.0  ;;  %v2492_v39 = vld [vmem:[%s3862_s1 + $0x7c] ss:$56 sps:$4 sm:$0xff]   ;;  %v350_v45 = vmax.f32 %v134_v31, 0.0  ;;  %v132_v56 = vld [vmem:[%s3861_s0 + $0x3c0] sm:$0xff] }
  0x35   :  { %v2495_v40 = vld [vmem:[%s3862_s1 + $0x84] ss:$56 sps:$4 sm:$0xff]   ;;  %v118_v46 = vld [vmem:[%s3861_s0 + $0x350] sm:$0xff]  ;;  %v382_v50 = vmax.f32 %v166_v36, 0.0  ;;  %v522_v55 = vpack.c.bf16 %v385_v35, %v384_v34  ;;  %v348_v11 = vmax.f32 %v132_v56, 0.0 }
  0x36   :  { %1322 = vmatmul.mubr.bf16.gmra.mxu1 %v2478_v4  ;;  %1290 = vmatmul.mubr.bf16.gmra.mxu0 %v2479_v5  ;;  %v355_v4 = vmax.f32 %v139_v53, 0.0  ;;  %v123_v5 = vld [vmem:[%s3861_s0 + $0x378] sm:$0xff]  ;;  %v150_v52 = vld [vmem:[%s3861_s0 + $0x450] sm:$0xff]  ;;  %v334_v62 = vmax.f32 %v118_v46, 0.0  ;;  %v128_v36 = vld [vmem:[%s3861_s0 + $0x3a0] sm:$0xff] }
  0x37   :  { %2134 = vmatpush3.bf16.msra.mxu1 %v463_v19  ;;  %2198 = vmatpush3.bf16.msra.mxu0 %v479_v20  ;;  %v339_v15 = vmax.f32 %v123_v5, 0.0  ;;  %v460_v19 = vpack.c.bf16 %v261_v60, %v260_v59  ;;  %v476_v20 = vpack.c.bf16 %v293_v0, %v292_v61  ;;  %v151_v53 = vld [vmem:[%s3861_s0 + $0x458] sm:$0xff]  ;;  %v165_v59 = vld [vmem:[%s3861_s0 + $0x4c8] sm:$0xff]  ;;  %v514_v61 = vpack.c.bf16 %v369_v44, %v368_v43  ;;  %v116_v0 = vld [vmem:[%s3861_s0 + $0x340] sm:$0xff] }
  0x38   :  { %2135 = vmatprep.subr.bf16.mxu1 %v470_v27  ;;  %2199 = vmatprep.subr.bf16.mxu0 %v486_v28  ;;  %v523_v27 = vpack.c.bf16 %v387_v9, %v386_v8  ;;  %v370_v28 = vmax.f32 %v154_v10, 0.0  ;;  %v505_v5 = vpack.c.bf16 %v351_v48, %v350_v45  ;;  %v367_v8 = vmax.f32 %v151_v53, 0.0  ;;  %v149_v9 = vld [vmem:[%s3861_s0 + $0x448] sm:$0xff]  ;;  %v131_v16 = vld [vmem:[%s3861_s0 + $0x3b8] sm:$0xff]  ;;  %v114_v24 = vld [vmem:[%s3861_s0 + $0x330] sm:$0xff] }
  0x39   :  { %1329 = vmatprep.mubr.bf16.mxu1 %v2480_v21  ;;  %1297 = vmatprep.mubr.bf16.mxu0 %v2482_v22  ;;  %v507_v21 = vpack.c.bf16 %v355_v4, %v354_v3  ;;  %v121_v22 = vld [vmem:[%s3861_s0 + $0x368] sm:$0xff]  ;;  %v2494_v3 = vld [vmem:[%s3862_s1 + $0x78] ss:$56 sps:$4 sm:$0xff]   ;;  %v332_v18 = vmax.f32 %v116_v0, 0.0  ;;  %v365_v23 = vmax.f32 %v149_v9, 0.0  ;;  %v112_v44 = vld [vmem:[%s3861_s0 + $0x320] sm:$0xff] }
  0x3a   :  { %v515_v47 = vpack.c.bf16 %v371_v29, %v370_v28  ;;  %v2497_v4 = vld [vmem:[%s3862_s1 + $0x80] ss:$56 sps:$4 sm:$0xff]   ;;  %v2498_v10 = vld [vmem:[%s3862_s1 + $0xec] ss:$56 sps:$4 sm:$0xff]   ;;  %v347_v28 = vmax.f32 %v131_v16, 0.0 }
  0x3b   :  { %2136 = vmatpush3.bf16.msra.mxu1 %v462_v37  ;;  %2200 = vmatpush3.bf16.msra.mxu0 %v478_v38  ;;  %v167_v37 = vld [vmem:[%s3861_s0 + $0x4d8] sm:$0xff]  ;;  %v499_v38 = vpack.c.bf16 %v339_v15, %v338_v14  ;;  %v381_v14 = vmax.f32 %v165_v59, 0.0  ;;  %v130_v15 = vld [vmem:[%s3861_s0 + $0x3b0] sm:$0xff]  ;;  %v113_v45 = vld [vmem:[%s3861_s0 + $0x328] sm:$0xff] }
  0x3c   :  { %2137 = vmatprep.subr.bf16.mxu1 %v469_v42  ;;  %2201 = vmatprep.subr.bf16.mxu0 %v485_v49  ;;  %v337_v42 = vmax.f32 %v121_v22, 0.0  ;;  %v119_v49 = vld [vmem:[%s3861_s0 + $0x358] sm:$0xff]  ;;  %v383_v51 = vmax.f32 %v167_v37, 0.0  ;;  %v2501_v17 = vld [vmem:[%s3862_s1 + $0xf4] ss:$56 sps:$4 sm:$0xff]   ;;  %v124_v16 = vld [vmem:[%s3861_s0 + $0x380] sm:$0xff] }
  0x3d   :  { %v115_v29 = vld [vmem:[%s3861_s0 + $0x338] sm:$0xff]  ;;  %v129_v37 = vld [vmem:[%s3861_s0 + $0x3a8] sm:$0xff] }
  0x3e   :  { %1330 = vmatmul.mubr.bf16.gmra.mxu1 %v2484_v54  ;;  %1298 = vmatmul.mubr.bf16.gmra.mxu0 %v2485_v57  ;;  %v506_v54 = vpack.c.bf16 %v353_v33, %v352_v30  ;;  %v133_v57 = vld [vmem:[%s3861_s0 + $0x3c8] sm:$0xff]  ;;  %v498_v60 = vpack.c.bf16 %v337_v42, %v336_v41  ;;  %v146_v30 = vld [vmem:[%s3861_s0 + $0x430] sm:$0xff]  ;;  %v147_v31 = vld [vmem:[%s3861_s0 + $0x438] sm:$0xff]  ;;  %v330_v42 = vmax.f32 %v114_v24, 0.0  ;;  %v331_v43 = vmax.f32 %v115_v29, 0.0 }
  0x3f   :  { %2138 = vmatpush3.bf16.msra.mxu1 %v461_v58  ;;  %2202 = vmatpush3.bf16.msra.mxu0 %v477_v63  ;;  %v164_v58 = vld [vmem:[%s3861_s0 + $0x4c0] sm:$0xff]  ;;  %v335_v63 = vmax.f32 %v119_v49, 0.0  ;;  %v349_v12 = vmax.f32 %v133_v57, 0.0  ;;  %v362_v49 = vmax.f32 %v146_v30, 0.0  ;;  %v145_v53 = vld [vmem:[%s3861_s0 + $0x428] sm:$0xff]  ;;  %v345_v57 = vmax.f32 %v129_v37, 0.0 }
  0x40   :  { %2139 = vmatprep.subr.bf16.mxu1 %v468_v6  ;;  %2203 = vmatprep.subr.bf16.mxu0 %v484_v7  ;;  %v521_v6 = vpack.c.bf16 %v383_v51, %v382_v50  ;;  %v366_v7 = vmax.f32 %v150_v52, 0.0  ;;  %v380_v13 = vmax.f32 %v164_v58, 0.0  ;;  %v2500_v46 = vld [vmem:[%s3862_s1 + $0xe8] ss:$56 sps:$4 sm:$0xff]   ;;  %v363_v50 = vmax.f32 %v147_v31, 0.0  ;;  %v111_v9 = vld [vmem:[%s3861_s0 + $0x318] sm:$0xff] }
  0x41   :  { %1370 = vmatprep.mubr.bf16.mxu1 %v2488_v1  ;;  %1467 = vmatprep.mubr.bf16.mxu0 %v2491_v2  ;;  %v117_v1 = vld [vmem:[%s3861_s0 + $0x348] sm:$0xff]  ;;  %v148_v2 = vld [vmem:[%s3861_s0 + $0x440] sm:$0xff]  ;;  %v504_v32 = vpack.c.bf16 %v349_v12, %v348_v11  ;;  %v344_v51 = vmax.f32 %v128_v36, 0.0  ;;  %v495_v0 = vpack.c.bf16 %v331_v43, %v330_v42  ;;  %v143_v11 = vld [vmem:[%s3861_s0 + $0x418] sm:$0xff]  ;;  %v340_v29 = vmax.f32 %v124_v16, 0.0 }
  0x42   :  { %v364_v22 = vmax.f32 %v148_v2, 0.0  ;;  %v520_v33 = vpack.c.bf16 %v381_v14, %v380_v13  ;;  %v144_v52 = vld [vmem:[%s3861_s0 + $0x420] sm:$0xff]  ;;  %v329_v2 = vmax.f32 %v113_v45, 0.0  ;;  %v2506_v24 = vld [vmem:[%s3862_s1 + $0x158] ss:$56 sps:$4 sm:$0xff]   ;;  %v141_v37 = vld [vmem:[%s3861_s0 + $0x408] sm:$0xff] }
  0x43   :  { %2140 = vmatpush3.bf16.msra.mxu1 %v460_v19  ;;  %2204 = vmatpush3.bf16.msra.mxu0 %v476_v20  ;;  %v162_v19 = vld [vmem:[%s3861_s0 + $0x4b0] sm:$0xff]  ;;  %v163_v20 = vld [vmem:[%s3861_s0 + $0x4b8] sm:$0xff]  ;;  %v502_v12 = vpack.c.bf16 %v345_v57, %v344_v51  ;;  %v108_v30 = vld [vmem:[%s3861_s0 + $0x300] sm:$0xff] }
  0x44   :  { %2253 = vmatprep.subr.bf16.mxu1 %v507_v21  ;;  %2317 = vmatprep.subr.bf16.mxu0 %v523_v27  ;;  %v333_v21 = vmax.f32 %v117_v1, 0.0  ;;  %v346_v27 = vmax.f32 %v130_v15, 0.0  ;;  %v378_v34 = vmax.f32 %v162_v19, 0.0  ;;  %v379_v35 = vmax.f32 %v163_v20, 0.0  ;;  %v157_v19 = vld [vmem:[%s3861_s0 + $0x488] sm:$0xff]  ;;  %v140_v36 = vld [vmem:[%s3861_s0 + $0x400] sm:$0xff] }
  0x45   :  { %v512_v41 = vpack.c.bf16 %v365_v23, %v364_v22  ;;  %v328_v1 = vmax.f32 %v112_v44, 0.0  ;;  %v359_v23 = vmax.f32 %v143_v11, 0.0  ;;  %v324_v44 = vmax.f32 %v108_v30, 0.0  ;;  %v2516_v57 = vld [vmem:[%s3862_s1 + $0x23c] ss:$56 sps:$4 sm:$0xff]  }
  0x46   :  { %1371 = vmatmul.mubr.bf16.vlgmr.msra.gmra.mxu1 %v2486_v25  ;;  %1468 = vmatmul.mubr.bf16.vlgmr.msra.gmra.mxu0 %v2489_v26  ;;  %v497_v25 = vpack.c.bf16 %v335_v63, %v334_v62  ;;  %v513_v26 = vpack.c.bf16 %v367_v8, %v366_v7  ;;  %v503_v48 = vpack.c.bf16 %v347_v28, %v346_v27  ;;  %v158_v62 = vld [vmem:[%s3861_s0 + $0x490] sm:$0xff]  ;;  %v159_v63 = vld [vmem:[%s3861_s0 + $0x498] sm:$0xff] }
  0x47   :  { %2254 = vmatpush3.bf16.msra.mxu1 %v499_v38  ;;  %1378 = vmatprep.mubr.bf16.mxu1 %v2492_v39  ;;  %v160_v38 = vld [vmem:[%s3861_s0 + $0x4a0] sm:$0xff]  ;;  %v161_v39 = vld [vmem:[%s3861_s0 + $0x4a8] sm:$0xff]  ;;  %v519_v56 = vpack.c.bf16 %v379_v35, %v378_v34  ;;  %v374_v14 = vmax.f32 %v158_v62, 0.0  ;;  %v375_v15 = vmax.f32 %v159_v63, 0.0  ;;  %v373_v35 = vmax.f32 %v157_v19, 0.0  ;;  %v219_v11 = vld [vmem:[%s3861_s0 + $0x678] sm:$0xff] }
  0x48   :  { %2318 = vmatpush3.bf16.msra.mxu0 %v515_v47  ;;  %1475 = vmatprep.mubr.bf16.mxu0 %v2495_v40  ;;  %v496_v40 = vpack.c.bf16 %v333_v21, %v332_v18  ;;  %v2503_v47 = vld [vmem:[%s3862_s1 + $0xf0] ss:$56 sps:$4 sm:$0xff]   ;;  %v376_v58 = vmax.f32 %v160_v38, 0.0  ;;  %v377_v59 = vmax.f32 %v161_v39, 0.0  ;;  %v156_v18 = vld [vmem:[%s3861_s0 + $0x480] sm:$0xff]  ;;  %v327_v21 = vmax.f32 %v111_v9, 0.0 }
  0x49   :  { %2255 = vmatprep.subr.bf16.mxu1 %v506_v54  ;;  %2319 = vmatprep.subr.bf16.mxu0 %v522_v55  ;;  %v2504_v54 = vld [vmem:[%s3862_s1 + $0x15c] ss:$56 sps:$4 sm:$0xff]   ;;  %v517_v31 = vpack.c.bf16 %v375_v15, %v374_v14  ;;  %v372_v34 = vmax.f32 %v156_v18, 0.0  ;;  %v2522_v62 = vld [vmem:[%s3862_s1 + $0x2ac] ss:$56 sps:$4 sm:$0xff]  }
  0x4a   :  { %v2507_v55 = vld [vmem:[%s3862_s1 + $0x164] ss:$56 sps:$4 sm:$0xff]   ;;  %v518_v13 = vpack.c.bf16 %v377_v59, %v376_v58  ;;  %v202_v38 = vld [vmem:[%s3861_s0 + $0x5f0] sm:$0xff]  ;;  %v2630_v59 = vmov 0   ;;  %v185_v15 = vld [vmem:[%s3861_s0 + $0x568] sm:$0xff] }
  0x4b   :  { %2256 = vmatpush3.bf16.msra.mxu1 %v498_v60  ;;  %v126_v60 = vld [vmem:[%s3861_s0 + $0x390] sm:$0xff]  ;;  %v203_v39 = vld [vmem:[%s3861_s0 + $0x5f8] sm:$0xff]  ;;  %v184_v14 = vld [vmem:[%s3861_s0 + $0x560] sm:$0xff] }
  0x4c   :  { %2320 = vmatpush3.bf16.msra.mxu0 %v514_v61  ;;  %2257 = vmatprep.subr.bf16.mxu1 %v505_v5  ;;  %v127_v61 = vld [vmem:[%s3861_s0 + $0x398] sm:$0xff]  ;;  %v511_v5 = vpack.c.bf16 %v363_v50, %v362_v49  ;;  %v342_v7 = vmax.f32 %v126_v60, 0.0  ;;  %v516_v49 = vpack.c.bf16 %v373_v35, %v372_v34  ;;  %v418_v50 = vmax.f32 %v202_v38, 0.0  ;;  %v2525_v63 = vld [vmem:[%s3862_s1 + $0x2b4] ss:$56 sps:$4 sm:$0xff]   ;;  %v216_v18 = vld [vmem:[%s3861_s0 + $0x660] sm:$0xff] }
  0x4d   :  { %2321 = vmatprep.subr.bf16.mxu0 %v521_v6  ;;  %v361_v6 = vmax.f32 %v145_v53, 0.0  ;;  %v343_v8 = vmax.f32 %v127_v61, 0.0  ;;  %v419_v51 = vmax.f32 %v203_v39, 0.0  ;;  %v2519_v58 = vld [vmem:[%s3862_s1 + $0x244] ss:$56 sps:$4 sm:$0xff]   ;;  %v182_v34 = vld [vmem:[%s3861_s0 + $0x550] sm:$0xff] }
  0x4e   :  { %1379 = vmatmul.mubr.bf16.gmra.mxu1 %v2494_v3  ;;  %1476 = vmatmul.mubr.bf16.gmra.mxu0 %v2497_v4  ;;  %v360_v3 = vmax.f32 %v144_v52, 0.0  ;;  %v110_v4 = vld [vmem:[%s3861_s0 + $0x310] sm:$0xff]  ;;  %v2521_v61 = vld [vmem:[%s3862_s1 + $0x240] ss:$56 sps:$4 sm:$0xff]  }
  0x4f   :  { %1386 = vmatprep.mubr.bf16.mxu1 %v2498_v10  ;;  %1483 = vmatprep.mubr.bf16.mxu0 %v2501_v17  ;;  %v142_v10 = vld [vmem:[%s3861_s0 + $0x410] sm:$0xff]  ;;  %v125_v17 = vld [vmem:[%s3861_s0 + $0x388] sm:$0xff]  ;;  %v326_v20 = vmax.f32 %v110_v4, 0.0  ;;  %v501_v28 = vpack.c.bf16 %v343_v8, %v342_v7  ;;  %v2539_v7 = vld [vmem:[%s3862_s1 + $0x24] ss:$56 sps:$4 sm:$0xff]  }
  0x50   :  { %2258 = vmatpush3.bf16.msra.mxu1 %v497_v25  ;;  %2322 = vmatpush3.bf16.msra.mxu0 %v513_v26  ;;  %v358_v22 = vmax.f32 %v142_v10, 0.0  ;;  %v2509_v25 = vld [vmem:[%s3862_s1 + $0x160] ss:$56 sps:$4 sm:$0xff]   ;;  %v494_v26 = vpack.c.bf16 %v329_v2, %v328_v1  ;;  %v510_v27 = vpack.c.bf16 %v361_v6, %v360_v3  ;;  %v2527_v1 = vld [vmem:[%s3862_s1 + $0x2b0] ss:$56 sps:$4 sm:$0xff]  }
  0x51   :  { %2259 = vmatprep.subr.bf16.mxu1 %v504_v32  ;;  %2323 = vmatprep.subr.bf16.mxu0 %v520_v33  ;;  %v341_v32 = vmax.f32 %v125_v17, 0.0  ;;  %v109_v33 = vld [vmem:[%s3861_s0 + $0x308] sm:$0xff]  ;;  %v493_v42 = vpack.c.bf16 %v327_v21, %v326_v20  ;;  %v2518_v60 = vld [vmem:[%s3862_s1 + $0x238] ss:$56 sps:$4 sm:$0xff]   ;;  %v2528_v2 = vld [vmem:[%s3862_s1 + $0x31c] ss:$56 sps:$4 sm:$0xff]  }
  0x52   :  { %v509_v43 = vpack.c.bf16 %v359_v23, %v358_v22  ;;  %v325_v45 = vmax.f32 %v109_v33, 0.0  ;;  %v2531_v3 = vld [vmem:[%s3862_s1 + $0x324] ss:$56 sps:$4 sm:$0xff]   ;;  %v2530_v4 = vld [vmem:[%s3862_s1 + $0x318] ss:$56 sps:$4 sm:$0xff]   ;;  %v435_v22 = vmax.f32 %v219_v11, 0.0 }
  0x53   :  { %v2536_v6 = vld [vmem:[%s3862_s1 + $0x1c] ss:$56 sps:$4 sm:$0xff]   ;;  %v2534_v19 = vld [vmem:[%s3862_s1 + $0x18] ss:$56 sps:$4 sm:$0xff]   ;;  %v217_v23 = vld [vmem:[%s3861_s0 + $0x668] sm:$0xff]  ;;  %v432_v33 = vmax.f32 %v216_v18, 0.0 }
  0x54   :  { %2260 = vmatpush3.bf16.msra.mxu1 %v496_v40  ;;  %2324 = vmatpush3.bf16.msra.mxu0 %v512_v41  ;;  %v2510_v40 = vld [vmem:[%s3862_s1 + $0x1cc] ss:$56 sps:$4 sm:$0xff]   ;;  %v492_v52 = vpack.c.bf16 %v325_v45, %v324_v44  ;;  %v186_v8 = vld [vmem:[%s3861_s0 + $0x570] sm:$0xff]  ;;  %v187_v9 = vld [vmem:[%s3861_s0 + $0x578] sm:$0xff] }
  0x55   :  { %2261 = vmatprep.subr.bf16.mxu1 %v503_v48  ;;  %2325 = vmatprep.subr.bf16.mxu0 %v519_v56  ;;  %v2513_v41 = vld [vmem:[%s3862_s1 + $0x1d4] ss:$56 sps:$4 sm:$0xff]   ;;  %v500_v48 = vpack.c.bf16 %v341_v32, %v340_v29  ;;  %v2515_v56 = vld [vmem:[%s3862_s1 + $0x1d0] ss:$56 sps:$4 sm:$0xff]   ;;  %v402_v16 = vmax.f32 %v186_v8, 0.0  ;;  %v403_v17 = vmax.f32 %v187_v9, 0.0 }
  0x56   :  { %1387 = vmatmul.mubr.bf16.gmra.mxu1 %v2500_v46  ;;  %1484 = vmatmul.mubr.bf16.gmra.mxu0 %v2503_v47  ;;  %v356_v46 = vmax.f32 %v140_v36, 0.0  ;;  %v357_v47 = vmax.f32 %v141_v37, 0.0  ;;  %v218_v10 = vld [vmem:[%s3861_s0 + $0x670] sm:$0xff]  ;;  %v2537_v20 = vld [vmem:[%s3862_s1 + $0x20] ss:$56 sps:$4 sm:$0xff]   ;;  %v401_v32 = vmax.f32 %v185_v15, 0.0 }
  0x57   :  { %1394 = vmatprep.mubr.bf16.mxu1 %v2504_v54  ;;  %1491 = vmatprep.mubr.bf16.mxu0 %v2507_v55  ;;  %v539_v54 = vpack.c.bf16 %v419_v51, %v418_v50  ;;  %v2512_v55 = vld [vmem:[%s3862_s1 + $0x1c8] ss:$56 sps:$4 sm:$0xff]   ;;  %v434_v21 = vmax.f32 %v218_v10, 0.0  ;;  %v2543_v29 = vld [vmem:[%s3862_s1 + $0x94] ss:$56 sps:$4 sm:$0xff]   ;;  %v531_v30 = vpack.c.bf16 %v403_v17, %v402_v16  ;;  %v183_v35 = vld [vmem:[%s3861_s0 + $0x558] sm:$0xff] }
  0x58   :  { %2262 = vmatpush3.bf16.msra.mxu1 %v495_v0  ;;  %2326 = vmatpush3.bf16.msra.mxu0 %v511_v5  ;;  %v508_v53 = vpack.c.bf16 %v357_v47, %v356_v46  ;;  %v2524_v0 = vld [vmem:[%s3862_s1 + $0x2a8] ss:$56 sps:$4 sm:$0xff]   ;;  %v433_v37 = vmax.f32 %v217_v23, 0.0  ;;  %v398_v46 = vmax.f32 %v182_v34, 0.0  ;;  %v399_v47 = vmax.f32 %v183_v35, 0.0  ;;  %v178_v9 = vld [vmem:[%s3861_s0 + $0x530] sm:$0xff] }
  0x59   :  { %2263 = vmatprep.subr.bf16.mxu1 %v502_v12  ;;  %2327 = vmatprep.subr.bf16.mxu0 %v518_v13  ;;  %v2533_v5 = vld [vmem:[%s3862_s1 + $0x320] ss:$56 sps:$4 sm:$0xff]   ;;  %v201_v13 = vld [vmem:[%s3861_s0 + $0x5e8] sm:$0xff]  ;;  %v547_v36 = vpack.c.bf16 %v435_v22, %v434_v21 }
  0x5a   :  { %v200_v12 = vld [vmem:[%s3861_s0 + $0x5e0] sm:$0xff]  ;;  %v197_v44 = vld [vmem:[%s3861_s0 + $0x5c8] sm:$0xff] }
  0x5b   :  { %v2542_v50 = vld [vmem:[%s3862_s1 + $0x88] ss:$56 sps:$4 sm:$0xff]   ;;  %v2555_v34 = vld [vmem:[%s3862_s1 + $0x174] ss:$56 sps:$4 sm:$0xff]  }
  0x5c   :  { %2264 = vmatpush3.bf16.msra.mxu1 %v494_v26  ;;  %2328 = vmatpush3.bf16.msra.mxu0 %v510_v27  ;;  %v417_v26 = vmax.f32 %v201_v13, 0.0  ;;  %v199_v27 = vld [vmem:[%s3861_s0 + $0x5d8] sm:$0xff]  ;;  %v2545_v51 = vld [vmem:[%s3862_s1 + $0x90] ss:$56 sps:$4 sm:$0xff]   ;;  %v208_v18 = vld [vmem:[%s3861_s0 + $0x620] sm:$0xff] }
  0x5d   :  { %2265 = vmatprep.subr.bf16.mxu1 %v501_v28  ;;  %2329 = vmatprep.subr.bf16.mxu0 %v517_v31  ;;  %v2540_v28 = vld [vmem:[%s3862_s1 + $0x8c] ss:$56 sps:$4 sm:$0xff]   ;;  %v400_v31 = vmax.f32 %v184_v14, 0.0  ;;  %v415_v39 = vmax.f32 %v199_v27, 0.0  ;;  %v179_v13 = vld [vmem:[%s3861_s0 + $0x538] sm:$0xff] }
  0x5e   :  { %1395 = vmatmul.mubr.bf16.gmra.mxu1 %v2506_v24  ;;  %1492 = vmatmul.mubr.bf16.gmra.mxu0 %v2509_v25  ;;  %v198_v24 = vld [vmem:[%s3861_s0 + $0x5d0] sm:$0xff]  ;;  %v416_v25 = vmax.f32 %v200_v12, 0.0  ;;  %v192_v14 = vld [vmem:[%s3861_s0 + $0x5a0] sm:$0xff]  ;;  %v193_v15 = vld [vmem:[%s3861_s0 + $0x5a8] sm:$0xff] }
  0x5f   :  { %1402 = vmatprep.mubr.bf16.mxu1 %v2510_v40  ;;  %1499 = vmatprep.mubr.bf16.mxu0 %v2513_v41  ;;  %v414_v38 = vmax.f32 %v198_v24, 0.0  ;;  %v214_v40 = vld [vmem:[%s3861_s0 + $0x650] sm:$0xff]  ;;  %v530_v45 = vpack.c.bf16 %v401_v32, %v400_v31  ;;  %v2551_v21 = vld [vmem:[%s3862_s1 + $0x100] ss:$56 sps:$4 sm:$0xff]   ;;  %v394_v24 = vmax.f32 %v178_v9, 0.0 }
  0x60   :  { %2266 = vmatpush3.bf16.msra.mxu1 %v493_v42  ;;  %2330 = vmatpush3.bf16.msra.mxu0 %v509_v43  ;;  %v538_v41 = vpack.c.bf16 %v417_v26, %v416_v25  ;;  %v215_v42 = vld [vmem:[%s3861_s0 + $0x658] sm:$0xff]  ;;  %v196_v43 = vld [vmem:[%s3861_s0 + $0x5c0] sm:$0xff]  ;;  %v395_v25 = vmax.f32 %v179_v13, 0.0  ;;  %v190_v31 = vld [vmem:[%s3861_s0 + $0x590] sm:$0xff] }
  0x61   :  { %2267 = vmatprep.subr.bf16.mxu1 %v500_v48  ;;  %2331 = vmatprep.subr.bf16.mxu0 %v516_v49  ;;  %v212_v48 = vld [vmem:[%s3861_s0 + $0x640] sm:$0xff]  ;;  %v213_v49 = vld [vmem:[%s3861_s0 + $0x648] sm:$0xff]  ;;  %v191_v32 = vld [vmem:[%s3861_s0 + $0x598] sm:$0xff] }
  0x62   :  { %v176_v26 = vld [vmem:[%s3861_s0 + $0x520] sm:$0xff] }
  0x64   :  { %2268 = vmatpush3.bf16.msra.mxu1 %v492_v52  ;;  %2332 = vmatpush3.bf16.msra.mxu0 %v508_v53  ;;  %v546_v52 = vpack.c.bf16 %v433_v37, %v432_v33  ;;  %v537_v53 = vpack.c.bf16 %v415_v39, %v414_v38  ;;  %v2552_v33 = vld [vmem:[%s3862_s1 + $0x16c] ss:$56 sps:$4 sm:$0xff]   ;;  %v527_v37 = vpack.c.bf16 %v395_v25, %v394_v24  ;;  %v206_v39 = vld [vmem:[%s3861_s0 + $0x610] sm:$0xff] }
  0x65   :  { %2381 = vmatprep.subr.bf16.mxu1 %v539_v54  ;;  %1823 = vmatprep.subr.bf16.mxu0 %v2630_v59  ;;  %v430_v54 = vmax.f32 %v214_v40, 0.0  ;;  %v207_v40 = vld [vmem:[%s3861_s0 + $0x618] sm:$0xff] }
  0x66   :  { %1403 = vmatmul.mubr.bf16.gmra.mxu1 %v2512_v55  ;;  %1500 = vmatmul.mubr.bf16.gmra.mxu0 %v2515_v56  ;;  %v431_v55 = vmax.f32 %v215_v42, 0.0  ;;  %v180_v56 = vld [vmem:[%s3861_s0 + $0x540] sm:$0xff] }
  0x67   :  { %1410 = vmatprep.mubr.bf16.mxu1 %v2516_v57  ;;  %1507 = vmatprep.mubr.bf16.mxu0 %v2519_v58  ;;  %v2546_v57 = vld [vmem:[%s3862_s1 + $0xfc] ss:$56 sps:$4 sm:$0xff]  }
  0x68   :  { %v2549_v58 = vld [vmem:[%s3862_s1 + $0x104] ss:$56 sps:$4 sm:$0xff]  }
  0x6e   :  { %1411 = vmatmul.mubr.bf16.gmra.mxu1 %v2518_v60  ;;  %1508 = vmatmul.mubr.bf16.gmra.mxu0 %v2521_v61  ;;  %v412_v60 = vmax.f32 %v196_v43, 0.0  ;;  %v413_v61 = vmax.f32 %v197_v44, 0.0  ;;  %v406_v44 = vmax.f32 %v190_v31, 0.0  ;;  %v220_v31 = vld [vmem:[%s3861_s0 + $0x680] sm:$0xff] }
  0x6f   :  { %1418 = vmatprep.mubr.bf16.mxu1 %v2522_v62  ;;  %1515 = vmatprep.mubr.bf16.mxu0 %v2525_v63  ;;  %v181_v62 = vld [vmem:[%s3861_s0 + $0x548] sm:$0xff]  ;;  %v194_v63 = vld [vmem:[%s3861_s0 + $0x5b0] sm:$0xff] }
  0x70   :  { %v397_v8 = vmax.f32 %v181_v62, 0.0  ;;  %v536_v10 = vpack.c.bf16 %v413_v61, %v412_v60  ;;  %v410_v11 = vmax.f32 %v194_v63, 0.0  ;;  %v172_v62 = vld [vmem:[%s3861_s0 + $0x500] sm:$0xff]  ;;  %v173_v63 = vld [vmem:[%s3861_s0 + $0x508] sm:$0xff] }
  0x71   :  { %v389_v9 = vmax.f32 %v173_v63, 0.0  ;;  %v2606_v63 = vld [vmem:[%s3862_s1 + $0x1ec] ss:$56 sps:$4 sm:$0xff]  }
  0x76   :  { %1419 = vmatmul.mubr.bf16.gmra.mxu1 %v2524_v0  ;;  %1516 = vmatmul.mubr.bf16.gmra.mxu0 %v2527_v1  ;;  %v195_v0 = vld [vmem:[%s3861_s0 + $0x5b8] sm:$0xff]  ;;  %v529_v1 = vpack.c.bf16 %v399_v47, %v398_v46  ;;  %v174_v46 = vld [vmem:[%s3861_s0 + $0x510] sm:$0xff] }
  0x77   :  { %1426 = vmatprep.mubr.bf16.mxu1 %v2528_v2  ;;  %1523 = vmatprep.mubr.bf16.mxu0 %v2531_v3  ;;  %v428_v2 = vmax.f32 %v212_v48, 0.0  ;;  %v210_v3 = vld [vmem:[%s3861_s0 + $0x630] sm:$0xff]  ;;  %v411_v12 = vmax.f32 %v195_v0, 0.0  ;;  %v175_v47 = vld [vmem:[%s3861_s0 + $0x518] sm:$0xff]  ;;  %v188_v48 = vld [vmem:[%s3861_s0 + $0x580] sm:$0xff] }
  0x78   :  { %v426_v16 = vmax.f32 %v210_v3, 0.0  ;;  %v404_v60 = vmax.f32 %v188_v48, 0.0  ;;  %v2554_v0 = vld [vmem:[%s3862_s1 + $0x168] ss:$56 sps:$4 sm:$0xff]   ;;  %v2561_v3 = vld [vmem:[%s3862_s1 + $0x1e4] ss:$56 sps:$4 sm:$0xff]  }
  0x79   :  { %v535_v27 = vpack.c.bf16 %v411_v12, %v410_v11  ;;  %v227_v11 = vld [vmem:[%s3861_s0 + $0x6b8] sm:$0xff]  ;;  %v2582_v48 = vld [vmem:[%s3862_s1 + $0x28] ss:$56 sps:$4 sm:$0xff]  }
  0x7e   :  { %1427 = vmatmul.mubr.bf16.gmra.mxu1 %v2530_v4  ;;  %1524 = vmatmul.mubr.bf16.gmra.mxu0 %v2533_v5  ;;  %v211_v4 = vld [vmem:[%s3861_s0 + $0x638] sm:$0xff]  ;;  %v545_v5 = vpack.c.bf16 %v431_v55, %v430_v54  ;;  %v204_v54 = vld [vmem:[%s3861_s0 + $0x600] sm:$0xff]  ;;  %v390_v55 = vmax.f32 %v174_v46, 0.0 }
  0x7f   :  { %1564 = vmatprep.mubr.bf16.mxu1 %v2536_v6  ;;  %1661 = vmatprep.mubr.bf16.mxu0 %v2539_v7  ;;  %v429_v6 = vmax.f32 %v213_v49, 0.0  ;;  %v396_v7 = vmax.f32 %v180_v56, 0.0  ;;  %v427_v17 = vmax.f32 %v211_v4, 0.0  ;;  %v189_v49 = vld [vmem:[%s3861_s0 + $0x588] sm:$0xff]  ;;  %v391_v56 = vmax.f32 %v175_v47, 0.0 }
  0x80   :  { %v405_v61 = vmax.f32 %v189_v49, 0.0  ;;  %v2584_v46 = vld [vmem:[%s3862_s1 + $0x2c] ss:$56 sps:$4 sm:$0xff]   ;;  %v2585_v49 = vld [vmem:[%s3862_s1 + $0x30] ss:$56 sps:$4 sm:$0xff]  }
  0x81   :  { %v544_v22 = vpack.c.bf16 %v429_v6, %v428_v2  ;;  %v528_v23 = vpack.c.bf16 %v397_v8, %v396_v7  ;;  %v543_v35 = vpack.c.bf16 %v427_v17, %v426_v16  ;;  %v2558_v2 = vld [vmem:[%s3862_s1 + $0x1dc] ss:$56 sps:$4 sm:$0xff]   ;;  %v525_v7 = vpack.c.bf16 %v391_v56, %v390_v55  ;;  %v224_v17 = vld [vmem:[%s3861_s0 + $0x6a0] sm:$0xff] }
  0x82   :  { %v388_v8 = vmax.f32 %v172_v62, 0.0  ;;  %v532_v12 = vpack.c.bf16 %v405_v61, %v404_v60  ;;  %v440_v24 = vmax.f32 %v224_v17, 0.0  ;;  %v2587_v47 = vld [vmem:[%s3862_s1 + $0x34] ss:$56 sps:$4 sm:$0xff]   ;;  %v2596_v56 = vld [vmem:[%s3862_s1 + $0x108] ss:$56 sps:$4 sm:$0xff]  }
  0x83   :  { %v2597_v55 = vld [vmem:[%s3862_s1 + $0x114] ss:$56 sps:$4 sm:$0xff]   ;;  %v2603_v60 = vld [vmem:[%s3862_s1 + $0x184] ss:$56 sps:$4 sm:$0xff]   ;;  %v2602_v61 = vld [vmem:[%s3862_s1 + $0x178] ss:$56 sps:$4 sm:$0xff]  }
  0x84   :  { %v524_v16 = vpack.c.bf16 %v389_v9, %v388_v8  ;;  %v2605_v62 = vld [vmem:[%s3862_s1 + $0x180] ss:$56 sps:$4 sm:$0xff]  }
  0x86   :  { %1565 = vmatmul.mubr.bf16.vlgmr.msra.gmra.mxu1 %v2534_v19  ;;  %1662 = vmatmul.mubr.bf16.vlgmr.msra.gmra.mxu0 %v2537_v20  ;;  %v209_v19 = vld [vmem:[%s3861_s0 + $0x628] sm:$0xff]  ;;  %v2548_v20 = vld [vmem:[%s3862_s1 + $0xf8] ss:$56 sps:$4 sm:$0xff]  }
  0x87   :  { %2382 = vmatpush3.bf16.msra.mxu1 %v531_v30  ;;  %1572 = vmatprep.mubr.bf16.mxu1 %v2540_v28  ;;  %v408_v28 = vmax.f32 %v192_v14, 0.0  ;;  %v177_v30 = vld [vmem:[%s3861_s0 + $0x528] sm:$0xff]  ;;  %v425_v38 = vmax.f32 %v209_v19, 0.0  ;;  %v2560_v19 = vld [vmem:[%s3862_s1 + $0x1d8] ss:$56 sps:$4 sm:$0xff]  }
  0x88   :  { %1824 = vmatpush1.bf16.msra.mxu0 %v547_v36  ;;  %1669 = vmatprep.mubr.bf16.mxu0 %v2543_v29  ;;  %v409_v29 = vmax.f32 %v193_v15, 0.0  ;;  %v424_v36 = vmax.f32 %v208_v18, 0.0  ;;  %v393_v42 = vmax.f32 %v177_v30, 0.0  ;;  %v443_v15 = vmax.f32 %v227_v11, 0.0  ;;  %v225_v18 = vld [vmem:[%s3861_s0 + $0x6a8] sm:$0xff] }
  0x89   :  { %2383 = vmatprep.subr.bf16.mxu1 %v538_v41  ;;  %1825 = vmatprep.subr.bf16.mxu0 %v2630_v59  ;;  %v392_v41 = vmax.f32 %v176_v26, 0.0  ;;  %v441_v25 = vmax.f32 %v225_v18, 0.0  ;;  %v222_v26 = vld [vmem:[%s3861_s0 + $0x690] sm:$0xff] }
  0x8a   :  { %v534_v43 = vpack.c.bf16 %v409_v29, %v408_v28  ;;  %v438_v29 = vmax.f32 %v222_v26, 0.0 }
  0x8b   :  { %2384 = vmatpush3.bf16.msra.mxu1 %v530_v45  ;;  %v407_v45 = vmax.f32 %v191_v32, 0.0  ;;  %v550_v28 = vpack.c.bf16 %v441_v25, %v440_v24  ;;  %v221_v32 = vld [vmem:[%s3861_s0 + $0x688] sm:$0xff] }
  0x8c   :  { %1826 = vmatpush1.bf16.msra.mxu0 %v546_v52  ;;  %2385 = vmatprep.subr.bf16.mxu1 %v537_v53  ;;  %v542_v52 = vpack.c.bf16 %v425_v38, %v424_v36  ;;  %v526_v53 = vpack.c.bf16 %v393_v42, %v392_v41  ;;  %v2573_v36 = vld [vmem:[%s3862_s1 + $0x2c4] ss:$56 sps:$4 sm:$0xff]   ;;  %v436_v38 = vmax.f32 %v220_v31, 0.0  ;;  %v2572_v41 = vld [vmem:[%s3862_s1 + $0x2b8] ss:$56 sps:$4 sm:$0xff]  }
  0x8d   :  { %1827 = vmatprep.subr.bf16.mxu0 %v2630_v59  ;;  %v2575_v42 = vld [vmem:[%s3862_s1 + $0x2c0] ss:$56 sps:$4 sm:$0xff]   ;;  %v2624_v31 = vld [vmem:[%s3862_s1 + $0x33c] ss:$56 sps:$4 sm:$0xff]  }
  0x8e   :  { %1573 = vmatmul.mubr.bf16.gmra.mxu1 %v2542_v50  ;;  %1670 = vmatmul.mubr.bf16.gmra.mxu0 %v2545_v51  ;;  %v422_v50 = vmax.f32 %v206_v39, 0.0  ;;  %v423_v51 = vmax.f32 %v207_v40, 0.0  ;;  %v437_v39 = vmax.f32 %v221_v32, 0.0  ;;  %v2627_v32 = vld [vmem:[%s3862_s1 + $0x344] ss:$56 sps:$4 sm:$0xff]  }
  0x8f   :  { %1580 = vmatprep.mubr.bf16.mxu1 %v2546_v57  ;;  %1677 = vmatprep.mubr.bf16.mxu0 %v2549_v58  ;;  %v205_v57 = vld [vmem:[%s3861_s0 + $0x608] sm:$0xff]  ;;  %v533_v58 = vpack.c.bf16 %v407_v45, %v406_v44 }
  0x90   :  { %2386 = vmatpush3.bf16.msra.mxu1 %v529_v1  ;;  %1828 = vmatpush1.bf16.msra.mxu0 %v545_v5  ;;  %v2557_v1 = vld [vmem:[%s3862_s1 + $0x170] ss:$56 sps:$4 sm:$0xff]   ;;  %v541_v4 = vpack.c.bf16 %v423_v51, %v422_v50  ;;  %v420_v5 = vmax.f32 %v204_v54, 0.0  ;;  %v421_v6 = vmax.f32 %v205_v57, 0.0  ;;  %v548_v40 = vpack.c.bf16 %v437_v39, %v436_v38  ;;  %v2579_v44 = vld [vmem:[%s3862_s1 + $0x334] ss:$56 sps:$4 sm:$0xff]  }
  0x91   :  { %1829 = vmatprep.subr.bf16.mxu0 %v2630_v59  ;;  %2387 = vmatprep.subr.bf16.mxu1 %v536_v10  ;;  %v226_v10 = vld [vmem:[%s3861_s0 + $0x6b0] sm:$0xff]  ;;  %v2591_v51 = vld [vmem:[%s3862_s1 + $0xa4] ss:$56 sps:$4 sm:$0xff]  }
  0x92   :  { %v540_v13 = vpack.c.bf16 %v421_v6, %v420_v5  ;;  %v442_v14 = vmax.f32 %v226_v10, 0.0  ;;  %v2581_v45 = vld [vmem:[%s3862_s1 + $0x330] ss:$56 sps:$4 sm:$0xff]   ;;  %v2588_v50 = vld [vmem:[%s3862_s1 + $0x9c] ss:$56 sps:$4 sm:$0xff]  }
  0x93   :  { %v2594_v54 = vld [vmem:[%s3862_s1 + $0x10c] ss:$56 sps:$4 sm:$0xff]   ;;  %v2599_v57 = vld [vmem:[%s3862_s1 + $0x110] ss:$56 sps:$4 sm:$0xff]  }
  0x94   :  { %1830 = vmatpush1.bf16.msra.mxu0 %v544_v22  ;;  %2388 = vmatpush3.bf16.msra.mxu1 %v528_v23  ;;  %v2567_v22 = vld [vmem:[%s3862_s1 + $0x254] ss:$56 sps:$4 sm:$0xff]   ;;  %v551_v23 = vpack.c.bf16 %v443_v15, %v442_v14  ;;  %v2617_v14 = vld [vmem:[%s3862_s1 + $0x260] ss:$56 sps:$4 sm:$0xff]  }
  0x95   :  { %1831 = vmatprep.subr.bf16.mxu0 %v2630_v59  ;;  %2389 = vmatprep.subr.bf16.mxu1 %v535_v27  ;;  %v223_v27 = vld [vmem:[%s3861_s0 + $0x698] sm:$0xff]  ;;  %v2618_v15 = vld [vmem:[%s3862_s1 + $0x2cc] ss:$56 sps:$4 sm:$0xff]  }
  0x96   :  { %1581 = vmatmul.mubr.bf16.gmra.mxu1 %v2548_v20  ;;  %1678 = vmatmul.mubr.bf16.gmra.mxu0 %v2551_v21  ;;  %v2563_v20 = vld [vmem:[%s3862_s1 + $0x1e0] ss:$56 sps:$4 sm:$0xff]   ;;  %v2564_v21 = vld [vmem:[%s3862_s1 + $0x24c] ss:$56 sps:$4 sm:$0xff]   ;;  %v439_v30 = vmax.f32 %v223_v27, 0.0 }
  0x97   :  { %1588 = vmatprep.mubr.bf16.mxu1 %v2552_v33  ;;  %1685 = vmatprep.mubr.bf16.mxu0 %v2555_v34  ;;  %v2566_v33 = vld [vmem:[%s3862_s1 + $0x248] ss:$56 sps:$4 sm:$0xff]  }
  0x98   :  { %1832 = vmatpush1.bf16.msra.mxu0 %v543_v35  ;;  %2390 = vmatpush3.bf16.msra.mxu1 %v527_v37  ;;  %v2569_v34 = vld [vmem:[%s3862_s1 + $0x250] ss:$56 sps:$4 sm:$0xff]   ;;  %v2570_v35 = vld [vmem:[%s3862_s1 + $0x2bc] ss:$56 sps:$4 sm:$0xff]   ;;  %v549_v37 = vpack.c.bf16 %v439_v30, %v438_v29 }
  0x99   :  { %1833 = vmatprep.subr.bf16.mxu0 %v2630_v59  ;;  %2391 = vmatprep.subr.bf16.mxu1 %v534_v43  ;;  %v2576_v43 = vld [vmem:[%s3862_s1 + $0x32c] ss:$56 sps:$4 sm:$0xff]   ;;  %v2620_v29 = vld [vmem:[%s3862_s1 + $0x2c8] ss:$56 sps:$4 sm:$0xff]  }
  0x9a   :  { %v2623_v30 = vld [vmem:[%s3862_s1 + $0x2d0] ss:$56 sps:$4 sm:$0xff]  }
  0x9c   :  { %1834 = vmatpush1.bf16.msra.mxu0 %v542_v52  ;;  %2392 = vmatpush3.bf16.msra.mxu1 %v526_v53  ;;  %v2590_v52 = vld [vmem:[%s3862_s1 + $0x98] ss:$56 sps:$4 sm:$0xff]  }
  0x9d   :  { %1835 = vmatprep.subr.bf16.mxu0 %v2630_v59  ;;  %2393 = vmatprep.subr.bf16.mxu1 %v533_v58  ;;  %v2593_v53 = vld [vmem:[%s3862_s1 + $0xa0] ss:$56 sps:$4 sm:$0xff]   ;;  %v2600_v58 = vld [vmem:[%s3862_s1 + $0x17c] ss:$56 sps:$4 sm:$0xff]  }
  0x9e   :  { %1589 = vmatmul.mubr.bf16.gmra.mxu1 %v2554_v0  ;;  %1686 = vmatmul.mubr.bf16.gmra.mxu0 %v2557_v1  ;;  %v2609_v0 = vld [vmem:[%s3862_s1 + $0x1f4] ss:$56 sps:$4 sm:$0xff]   ;;  %v2608_v1 = vld [vmem:[%s3862_s1 + $0x1e8] ss:$56 sps:$4 sm:$0xff]  }
  0x9f   :  { %1596 = vmatprep.mubr.bf16.mxu1 %v2558_v2  ;;  %1693 = vmatprep.mubr.bf16.mxu0 %v2561_v3  ;;  %v2611_v2 = vld [vmem:[%s3862_s1 + $0x1f0] ss:$56 sps:$4 sm:$0xff]   ;;  %v2612_v3 = vld [vmem:[%s3862_s1 + $0x25c] ss:$56 sps:$4 sm:$0xff]  }
  0xa0   :  { %1836 = vmatpush1.bf16.msra.mxu0 %v541_v4  ;;  %2394 = vmatpush3.bf16.msra.mxu1 %v525_v7  ;;  %v2615_v4 = vld [vmem:[%s3862_s1 + $0x264] ss:$56 sps:$4 sm:$0xff]  }
  0xa1   :  { %1837 = vmatprep.subr.bf16.mxu0 %v2630_v59  ;;  %2395 = vmatprep.subr.bf16.mxu1 %v532_v12 }
  0xa4   :  { %1838 = vmatpush1.bf16.msra.mxu0 %v540_v13  ;;  %2396 = vmatpush3.bf16.msra.mxu1 %v524_v16  ;;  %v2614_v13 = vld [vmem:[%s3862_s1 + $0x258] ss:$56 sps:$4 sm:$0xff]   ;;  %v2621_v16 = vld [vmem:[%s3862_s1 + $0x2d4] ss:$56 sps:$4 sm:$0xff]  }
  0xa5   :  { %1847 = vmatprep.subr.bf16.mxu0 %v2630_v59 }
  0xa6   :  { %1597 = vmatmul.mubr.bf16.gmra.mxu1 %v2560_v19  ;;  %1694 = vmatmul.mubr.bf16.gmra.mxu0 %v2563_v20 }
  0xa7   :  { %1604 = vmatprep.mubr.bf16.mxu1 %v2564_v21  ;;  %1701 = vmatprep.mubr.bf16.mxu0 %v2567_v22 }
  0xa8   :  { %1848 = vmatpush2.bf16.msra.mxu0 %v551_v23 }
  0xa9   :  { %1849 = vmatprep.subr.bf16.mxu0 %v2630_v59 }
  0xac   :  { %1850 = vmatpush2.bf16.msra.mxu0 %v550_v28 }
  0xad   :  { %1851 = vmatprep.subr.bf16.mxu0 %v2630_v59 }
  0xae   :  { %1605 = vmatmul.mubr.bf16.gmra.mxu1 %v2566_v33  ;;  %1702 = vmatmul.mubr.bf16.gmra.mxu0 %v2569_v34 }
  0xaf   :  { %1612 = vmatprep.mubr.bf16.mxu1 %v2570_v35  ;;  %1709 = vmatprep.mubr.bf16.mxu0 %v2573_v36 }
  0xb0   :  { %1852 = vmatpush2.bf16.msra.mxu0 %v549_v37 }
  0xb1   :  { %1853 = vmatprep.subr.bf16.mxu0 %v2630_v59  ;;  %v2578_v59 = vld [vmem:[%s3862_s1 + $0x328] ss:$56 sps:$4 sm:$0xff]  }
  0xb4   :  { %1854 = vmatpush2.bf16.msra.mxu0 %v548_v40 }
  0xb6   :  { %1613 = vmatmul.mubr.bf16.gmra.mxu1 %v2572_v41  ;;  %1710 = vmatmul.mubr.bf16.gmra.mxu0 %v2575_v42 }
  0xb7   :  { %1620 = vmatprep.mubr.bf16.mxu1 %v2576_v43  ;;  %1717 = vmatprep.mubr.bf16.mxu0 %v2579_v44 }
  0xbe   :  { %1621 = vmatmul.mubr.bf16.gmra.mxu1 %v2578_v59  ;;  %1718 = vmatmul.mubr.bf16.gmra.mxu0 %v2581_v45  ;;  %v2626_v59 = vld [vmem:[%s3862_s1 + $0x338] ss:$56 sps:$4 sm:$0xff]  }
  0xbf   :  { %1758 = vmatprep.mubr.bf16.mxu1 %v2584_v46  ;;  %2053 = vmatprep.mubr.msk.bf16.mxu0 %vm1216_vm0, %v2587_v47  ;;  %v2629_v45 = vld [vmem:[%s3862_s1 + $0x340] ss:$56 sps:$4 sm:$0xff]  }
  0xc6   :  { %1759 = vmatmul.mubr.bf16.vlgmr.msra.gmra.mxu1 %v2582_v48  ;;  %1856 = vmatmul.mubr.bf16.vlgmr.msra.gmra.mxu0 %v2585_v49 }
  0xc7   :  { %1766 = vmatprep.mubr.bf16.mxu1 %v2588_v50  ;;  %2054 = vmatprep.mubr.msk.bf16.mxu0 %vm1216_vm0, %v2591_v51 }
  0xce   :  { %1767 = vmatmul.mubr.bf16.gmra.mxu1 %v2590_v52  ;;  %1864 = vmatmul.mubr.bf16.gmra.mxu0 %v2593_v53 }
  0xcf   :  { %1774 = vmatprep.mubr.bf16.mxu1 %v2594_v54  ;;  %2055 = vmatprep.mubr.msk.bf16.mxu0 %vm1216_vm0, %v2597_v55 }
  0xd6   :  { %1775 = vmatmul.mubr.bf16.gmra.mxu1 %v2596_v56  ;;  %1872 = vmatmul.mubr.bf16.gmra.mxu0 %v2599_v57 }
  0xd7   :  { %1782 = vmatprep.mubr.bf16.mxu1 %v2600_v58  ;;  %2056 = vmatprep.mubr.msk.bf16.mxu0 %vm1216_vm0, %v2603_v60 }
  0xde   :  { %1783 = vmatmul.mubr.bf16.gmra.mxu1 %v2602_v61  ;;  %1880 = vmatmul.mubr.bf16.gmra.mxu0 %v2605_v62 }
  0xdf   :  { %1790 = vmatprep.mubr.bf16.mxu1 %v2606_v63  ;;  %2057 = vmatprep.mubr.msk.bf16.mxu0 %vm1216_vm0, %v2609_v0 }
  0xe6   :  { %v2101_v5 = vpop.f32.mrf.mxu1  ;;  %1791 = vmatmul.mubr.bf16.gmra.mxu1 %v2608_v1  ;;  %v2077_v6 = vpop.f32.mrf.mxu0  ;;  %1888 = vmatmul.mubr.bf16.gmra.mxu0 %v2611_v2 }
  0xe7   :  { %1798 = vmatprep.mubr.bf16.mxu1 %v2612_v3  ;;  %2058 = vmatprep.mubr.msk.bf16.mxu0 %vm1216_vm0, %v2615_v4 }
  0xe8   :  { %v2102_v7 = vpop.f32.mrf.mxu1  ;;  %v2078_v8 = vpop.f32.mrf.mxu0 }
  0xe9   :  { %v3621_v9 = vadd.f32 %v2102_v7, %v2101_v5  ;;  %v3623_v10 = vadd.f32 %v2078_v8, %v2077_v6 }
  0xea   :  { %v2104_v11 = vpop.f32.mrf.mxu1  ;;  %v2080_v12 = vpop.f32.mrf.mxu0 }
  0xec   :  { %v2105_v17 = vpop.f32.mrf.mxu1  ;;  %v2081_v18 = vpop.f32.mrf.mxu0 }
  0xed   :  { %v3637_v19 = vadd.f32 %v2105_v17, %v2104_v11  ;;  %v3639_v20 = vadd.f32 %v2081_v18, %v2080_v12 }
  0xee   :  { %v2107_v21 = vpop.f32.mrf.mxu1  ;;  %1799 = vmatmul.mubr.bf16.gmra.mxu1 %v2614_v13  ;;  %v2083_v22 = vpop.f32.mrf.mxu0  ;;  %1896 = vmatmul.mubr.bf16.gmra.mxu0 %v2617_v14 }
  0xef   :  { %1806 = vmatprep.mubr.bf16.mxu1 %v2618_v15  ;;  %2059 = vmatprep.mubr.msk.bf16.mxu0 %vm1216_vm0, %v2621_v16 }
  0xf0   :  { %v2108_v23 = vpop.f32.mrf.mxu1  ;;  %v2084_v24 = vpop.f32.mrf.mxu0 }
  0xf1   :  { %v3642_v25 = vadd.f32 %v2108_v23, %v2107_v21  ;;  %v3644_v26 = vadd.f32 %v2084_v24, %v2083_v22 }
  0xf2   :  { %v2110_v27 = vpop.f32.mrf.mxu1  ;;  %v2086_v28 = vpop.f32.mrf.mxu0 }
  0xf4   :  { %v2111_v33 = vpop.f32.mrf.mxu1  ;;  %v2087_v34 = vpop.f32.mrf.mxu0 }
  0xf5   :  { %v3658_v35 = vadd.f32 %v2111_v33, %v2110_v27  ;;  %v3660_v36 = vadd.f32 %v2087_v34, %v2086_v28 }
  0xf6   :  { %v2113_v37 = vpop.f32.mrf.mxu1  ;;  %1807 = vmatmul.mubr.bf16.gmra.mxu1 %v2620_v29  ;;  %v2089_v38 = vpop.f32.mrf.mxu0  ;;  %1904 = vmatmul.mubr.bf16.gmra.mxu0 %v2623_v30 }
  0xf7   :  { %1814 = vmatprep.mubr.bf16.mxu1 %v2624_v31  ;;  %2060 = vmatprep.mubr.msk.bf16.mxu0 %vm1216_vm0, %v2627_v32 }
  0xf8   :  { %v2114_v39 = vpop.f32.mrf.mxu1  ;;  %v2090_v40 = vpop.f32.mrf.mxu0 }
  0xf9   :  { %v3663_v41 = vadd.f32 %v2114_v39, %v2113_v37  ;;  %v3665_v42 = vadd.f32 %v2090_v40, %v2089_v38 }
  0xfa   :  { %v2116_v43 = vpop.f32.mrf.mxu1  ;;  %v2092_v44 = vpop.f32.mrf.mxu0 }
  0xfc   :  { %v2117_v46 = vpop.f32.mrf.mxu1  ;;  %v2093_v47 = vpop.f32.mrf.mxu0 }
  0xfd   :  { %v3673_v48 = vadd.f32 %v2117_v46, %v2116_v43  ;;  %v3675_v49 = vadd.f32 %v2093_v47, %v2092_v44 }
  0xfe   :  { %v2119_v50 = vpop.f32.mrf.mxu1  ;;  %1815 = vmatmul.mubr.bf16.gmra.mxu1 %v2626_v59  ;;  %v2095_v51 = vpop.f32.mrf.mxu0  ;;  %1912 = vmatmul.mubr.bf16.gmra.mxu0 %v2629_v45 }
 0x100   :  { %v2120_v52 = vpop.f32.mrf.mxu1  ;;  %v2096_v53 = vpop.f32.mrf.mxu0 }
 0x101   :  { %v3677_v54 = vadd.f32 %v2120_v52, %v2119_v50  ;;  %v3679_v55 = vadd.f32 %v2096_v53, %v2095_v51 }
 0x102   :  { %v2122_v56 = vpop.f32.mrf.mxu1  ;;  %v2098_v57 = vpop.f32.mrf.mxu0 }
 0x104   :  { %v2123_v58 = vpop.f32.mrf.mxu1  ;;  %v2099_v60 = vpop.f32.mrf.mxu0 }
 0x105   :  { %v3681_v61 = vadd.f32 %v2123_v58, %v2122_v56  ;;  %v3683_v62 = vadd.f32 %v2099_v60, %v2098_v57 }
 0x106   :  { %v2141_v63 = vpop.f32.mrf.mxu1  ;;  %v2205_v0 = vpop.f32.mrf.mxu0 }
 0x108   :  { %v2142_v1 = vpop.f32.mrf.mxu1  ;;  %v2206_v2 = vpop.f32.mrf.mxu0 }
 0x109   :  { %v2143_v3 = vadd.f32 %v2142_v1, %v2141_v63  ;;  %v2207_v4 = vadd.f32 %v2206_v2, %v2205_v0 }
 0x10a   :  { %v2144_v5 = vpop.f32.mrf.mxu1  ;;  %v2208_v6 = vpop.f32.mrf.mxu0 }
 0x10b   :  { %v1373_v7 = vadd.f32 %v2143_v3, %v3623_v10 }
 0x10c   :  { %v2145_v8 = vpop.f32.mrf.mxu1  ;;  %v2209_v11 = vpop.f32.mrf.mxu0 }
 0x10d   :  { %v3686_v12 = vadd.f32 %v2207_v4, %v1373_v7  ;;  %v2146_v13 = vadd.f32 %v2145_v8, %v2144_v5  ;;  %v2210_v14 = vadd.f32 %v2209_v11, %v2208_v6 }
 0x10e   :  { %v2147_v15 = vpop.f32.mrf.mxu1  ;;  %v2211_v16 = vpop.f32.mrf.mxu0 }
 0x10f   :  { %v1376_v17 = vadd.f32 %v2146_v13, %v3639_v20 }
 0x110   :  { %v2148_v18 = vpop.f32.mrf.mxu1  ;;  %v2212_v21 = vpop.f32.mrf.mxu0 }
 0x111   :  { %v3689_v22 = vadd.f32 %v2210_v14, %v1376_v17  ;;  %v2149_v23 = vadd.f32 %v2148_v18, %v2147_v15  ;;  %v2213_v24 = vadd.f32 %v2212_v21, %v2211_v16 }
 0x112   :  { %v2150_v27 = vpop.f32.mrf.mxu1  ;;  %v2214_v28 = vpop.f32.mrf.mxu0 }
 0x113   :  { %v1381_v10 = vadd.f32 %v2149_v23, %v3644_v26 }
 0x114   :  { %v2151_v29 = vpop.f32.mrf.mxu1  ;;  %v2215_v30 = vpop.f32.mrf.mxu0 }
 0x115   :  { %v3692_v31 = vadd.f32 %v2213_v24, %v1381_v10  ;;  %v2152_v32 = vadd.f32 %v2151_v29, %v2150_v27  ;;  %v2216_v33 = vadd.f32 %v2215_v30, %v2214_v28 }
 0x116   :  { %v2153_v34 = vpop.f32.mrf.mxu1  ;;  %v2217_v37 = vpop.f32.mrf.mxu0 }
 0x117   :  { %v1384_v20 = vadd.f32 %v2152_v32, %v3660_v36 }
 0x118   :  { %v2154_v38 = vpop.f32.mrf.mxu1  ;;  %v2218_v39 = vpop.f32.mrf.mxu0 }
 0x119   :  { %v3695_v40 = vadd.f32 %v2216_v33, %v1384_v20  ;;  %v2155_v43 = vadd.f32 %v2154_v38, %v2153_v34  ;;  %v2219_v44 = vadd.f32 %v2218_v39, %v2217_v37 }
 0x11a   :  { %v2156_v59 = vpop.f32.mrf.mxu1  ;;  %v2220_v45 = vpop.f32.mrf.mxu0 }
 0x11b   :  { %v1389_v26 = vadd.f32 %v2155_v43, %v3665_v42 }
 0x11c   :  { %v2157_v46 = vpop.f32.mrf.mxu1  ;;  %v2221_v47 = vpop.f32.mrf.mxu0 }
 0x11d   :  { %v3698_v50 = vadd.f32 %v2219_v44, %v1389_v26  ;;  %v2158_v51 = vadd.f32 %v2157_v46, %v2156_v59  ;;  %v2222_v52 = vadd.f32 %v2221_v47, %v2220_v45 }
 0x11e   :  { %v2159_v53 = vpop.f32.mrf.mxu1  ;;  %v2223_v56 = vpop.f32.mrf.mxu0 }
 0x11f   :  { %v1392_v36 = vadd.f32 %v2158_v51, %v3675_v49 }
 0x120   :  { %v2160_v57 = vpop.f32.mrf.mxu1  ;;  %v2224_v58 = vpop.f32.mrf.mxu0 }
 0x121   :  { %v3701_v60 = vadd.f32 %v2222_v52, %v1392_v36  ;;  %v2161_v63 = vadd.f32 %v2160_v57, %v2159_v53  ;;  %v2225_v0 = vadd.f32 %v2224_v58, %v2223_v56 }
 0x122   :  { %v2162_v1 = vpop.f32.mrf.mxu1  ;;  %v2226_v2 = vpop.f32.mrf.mxu0 }
 0x123   :  { %v1397_v42 = vadd.f32 %v2161_v63, %v3679_v55 }
 0x124   :  { %v2163_v3 = vpop.f32.mrf.mxu1  ;;  %v2227_v4 = vpop.f32.mrf.mxu0 }
 0x125   :  { %v3704_v5 = vadd.f32 %v2225_v0, %v1397_v42  ;;  %v2164_v6 = vadd.f32 %v2163_v3, %v2162_v1  ;;  %v2228_v7 = vadd.f32 %v2227_v4, %v2226_v2 }
 0x126   :  { %v2165_v8 = vpop.f32.mrf.mxu1  ;;  %v2229_v11 = vpop.f32.mrf.mxu0 }
 0x127   :  { %v1400_v49 = vadd.f32 %v2164_v6, %v3683_v62 }
 0x128   :  { %v2166_v13 = vpop.f32.mrf.mxu1  ;;  %v2230_v14 = vpop.f32.mrf.mxu0 }
 0x129   :  { %v3707_v15 = vadd.f32 %v2228_v7, %v1400_v49  ;;  %v2167_v16 = vadd.f32 %v2166_v13, %v2165_v8  ;;  %v2231_v17 = vadd.f32 %v2230_v14, %v2229_v11 }
 0x12a   :  { %v2168_v18 = vpop.f32.mrf.mxu1  ;;  %v2232_v21 = vpop.f32.mrf.mxu0 }
 0x12b   :  { %v1405_v55 = vadd.f32 %v2167_v16, %v3621_v9 }
 0x12c   :  { %v2169_v23 = vpop.f32.mrf.mxu1  ;;  %v2233_v24 = vpop.f32.mrf.mxu0 }
 0x12d   :  { %v3710_v27 = vadd.f32 %v2231_v17, %v1405_v55  ;;  %v2170_v28 = vadd.f32 %v2169_v23, %v2168_v18  ;;  %v2234_v10 = vadd.f32 %v2233_v24, %v2232_v21 }
 0x12e   :  { %v2171_v29 = vpop.f32.mrf.mxu1  ;;  %v2235_v30 = vpop.f32.mrf.mxu0 }
 0x12f   :  { %v1408_v62 = vadd.f32 %v2170_v28, %v3637_v19 }
 0x130   :  { %v2172_v32 = vpop.f32.mrf.mxu1  ;;  %v2236_v33 = vpop.f32.mrf.mxu0 }
 0x131   :  { %v3713_v34 = vadd.f32 %v2234_v10, %v1408_v62  ;;  %v2173_v37 = vadd.f32 %v2172_v32, %v2171_v29  ;;  %v2237_v20 = vadd.f32 %v2236_v33, %v2235_v30 }
 0x132   :  { %v2174_v38 = vpop.f32.mrf.mxu1  ;;  %v2238_v39 = vpop.f32.mrf.mxu0 }
 0x133   :  { %v1413_v9 = vadd.f32 %v2173_v37, %v3642_v25 }
 0x134   :  { %v2175_v43 = vpop.f32.mrf.mxu1  ;;  %v2239_v44 = vpop.f32.mrf.mxu0 }
 0x135   :  { %v3716_v59 = vadd.f32 %v2237_v20, %v1413_v9  ;;  %v2176_v45 = vadd.f32 %v2175_v43, %v2174_v38  ;;  %v2240_v26 = vadd.f32 %v2239_v44, %v2238_v39 }
 0x136   :  { %v2177_v46 = vpop.f32.mrf.mxu1  ;;  %v2241_v47 = vpop.f32.mrf.mxu0 }
 0x137   :  { %v1416_v19 = vadd.f32 %v2176_v45, %v3658_v35 }
 0x138   :  { %v2178_v51 = vpop.f32.mrf.mxu1  ;;  %v2242_v52 = vpop.f32.mrf.mxu0 }
 0x139   :  { %v3719_v53 = vadd.f32 %v2240_v26, %v1416_v19  ;;  %v2179_v56 = vadd.f32 %v2178_v51, %v2177_v46  ;;  %v2243_v36 = vadd.f32 %v2242_v52, %v2241_v47 }
 0x13a   :  { %v2180_v57 = vpop.f32.mrf.mxu1  ;;  %v2244_v58 = vpop.f32.mrf.mxu0 }
 0x13b   :  { %v1421_v25 = vadd.f32 %v2179_v56, %v3663_v41 }
 0x13c   :  { %v2181_v63 = vpop.f32.mrf.mxu1  ;;  %v2245_v0 = vpop.f32.mrf.mxu0 }
 0x13d   :  { %v3722_v1 = vadd.f32 %v2243_v36, %v1421_v25  ;;  %v2182_v2 = vadd.f32 %v2181_v63, %v2180_v57  ;;  %v2246_v42 = vadd.f32 %v2245_v0, %v2244_v58 }
 0x13e   :  { %v2183_v3 = vpop.f32.mrf.mxu1  ;;  %v2247_v4 = vpop.f32.mrf.mxu0 }
 0x13f   :  { %v1424_v35 = vadd.f32 %v2182_v2, %v3673_v48 }
 0x140   :  { %v2184_v6 = vpop.f32.mrf.mxu1  ;;  %v2248_v7 = vpop.f32.mrf.mxu0 }
 0x141   :  { %v3725_v8 = vadd.f32 %v2246_v42, %v1424_v35  ;;  %v2185_v11 = vadd.f32 %v2184_v6, %v2183_v3  ;;  %v2249_v49 = vadd.f32 %v2248_v7, %v2247_v4 }
 0x142   :  { %v2186_v13 = vpop.f32.mrf.mxu1  ;;  %v2250_v14 = vpop.f32.mrf.mxu0 }
 0x143   :  { %v1429_v41 = vadd.f32 %v2185_v11, %v3677_v54 }
 0x144   :  { %v2187_v16 = vpop.f32.mrf.mxu1  ;;  %v2251_v17 = vpop.f32.mrf.mxu0 }
 0x145   :  { %v3728_v18 = vadd.f32 %v2249_v49, %v1429_v41  ;;  %v2188_v21 = vadd.f32 %v2187_v16, %v2186_v13  ;;  %v2252_v55 = vadd.f32 %v2251_v17, %v2250_v14 }
 0x146   :  { %v2269_v23 = vpop.f32.mrf.mxu1  ;;  %v2333_v24 = vpop.f32.mrf.mxu0 }
 0x147   :  { %v1432_v48 = vadd.f32 %v2188_v21, %v3681_v61 }
 0x148   :  { %v2270_v28 = vpop.f32.mrf.mxu1  ;;  %v2334_v10 = vpop.f32.mrf.mxu0 }
 0x149   :  { %v3731_v29 = vadd.f32 %v2252_v55, %v1432_v48  ;;  %v2271_v30 = vadd.f32 %v2270_v28, %v2269_v23  ;;  %v2335_v62 = vadd.f32 %v2334_v10, %v2333_v24 }
 0x14a   :  { %v2272_v32 = vpop.f32.mrf.mxu1  ;;  %v2336_v33 = vpop.f32.mrf.mxu0 }
 0x14b   :  { %v1567_v54 = vadd.f32 %v2271_v30, %v3686_v12 }
 0x14c   :  { %v2273_v37 = vpop.f32.mrf.mxu1  ;;  %v2337_v20 = vpop.f32.mrf.mxu0 }
 0x14d   :  { %v3734_v38 = vadd.f32 %v2335_v62, %v1567_v54  ;;  %v2274_v39 = vadd.f32 %v2273_v37, %v2272_v32  ;;  %v2338_v61 = vadd.f32 %v2337_v20, %v2336_v33 }
 0x14e   :  { %v2275_v9 = vpop.f32.mrf.mxu1  ;;  %v2339_v43 = vpop.f32.mrf.mxu0 }
 0x14f   :  { %v1570_v44 = vadd.f32 %v2274_v39, %v3689_v22 }
 0x150   :  { %v2276_v45 = vpop.f32.mrf.mxu1  ;;  %v2340_v26 = vpop.f32.mrf.mxu0 }
 0x151   :  { %v3737_v46 = vadd.f32 %v2338_v61, %v1570_v44  ;;  %v2277_v47 = vadd.f32 %v2276_v45, %v2275_v9  ;;  %v2341_v19 = vadd.f32 %v2340_v26, %v2339_v43 }
 0x152   :  { %v2278_v51 = vpop.f32.mrf.mxu1  ;;  %v2342_v52 = vpop.f32.mrf.mxu0 }
 0x153   :  { %v1575_v12 = vadd.f32 %v2277_v47, %v3692_v31 }
 0x154   :  { %v2279_v56 = vpop.f32.mrf.mxu1  ;;  %v2343_v36 = vpop.f32.mrf.mxu0 }
 0x155   :  { %v3740_v57 = vadd.f32 %v2341_v19, %v1575_v12  ;;  %v2280_v58 = vadd.f32 %v2279_v56, %v2278_v51  ;;  %v2344_v0 = vadd.f32 %v2343_v36, %v2342_v52 }
 0x156   :  { %v2281_v25 = vpop.f32.mrf.mxu1  ;;  %v2345_v63 = vpop.f32.mrf.mxu0 }
 0x157   :  { %v1578_v22 = vadd.f32 %v2280_v58, %v3695_v40 }
 0x158   :  { %v2282_v2 = vpop.f32.mrf.mxu1  ;;  %v2346_v42 = vpop.f32.mrf.mxu0 }
 0x159   :  { %v3743_v3 = vadd.f32 %v2344_v0, %v1578_v22  ;;  %v2283_v4 = vadd.f32 %v2282_v2, %v2281_v25  ;;  %v2347_v35 = vadd.f32 %v2346_v42, %v2345_v63 }
 0x15a   :  { %v2284_v6 = vpop.f32.mrf.mxu1  ;;  %v2348_v7 = vpop.f32.mrf.mxu0 }
 0x15b   :  { %v1583_v31 = vadd.f32 %v2283_v4, %v3698_v50 }
 0x15c   :  { %v2285_v11 = vpop.f32.mrf.mxu1  ;;  %v2349_v49 = vpop.f32.mrf.mxu0 }
 0x15d   :  { %v3746_v13 = vadd.f32 %v2347_v35, %v1583_v31  ;;  %v2286_v14 = vadd.f32 %v2285_v11, %v2284_v6  ;;  %v2350_v17 = vadd.f32 %v2349_v49, %v2348_v7 }
 0x15e   :  { %v2287_v41 = vpop.f32.mrf.mxu1  ;;  %v2351_v16 = vpop.f32.mrf.mxu0 }
 0x15f   :  { %v1586_v40 = vadd.f32 %v2286_v14, %v3701_v60 }
 0x160   :  { %v2288_v21 = vpop.f32.mrf.mxu1  ;;  %v2352_v55 = vpop.f32.mrf.mxu0 }
 0x161   :  { %v3749_v23 = vadd.f32 %v2350_v17, %v1586_v40  ;;  %v2289_v24 = vadd.f32 %v2288_v21, %v2287_v41  ;;  %v2353_v48 = vadd.f32 %v2352_v55, %v2351_v16 }
 0x162   :  { %v2290_v28 = vpop.f32.mrf.mxu1  ;;  %v2354_v10 = vpop.f32.mrf.mxu0 }
 0x163   :  { %v1591_v50 = vadd.f32 %v2289_v24, %v3704_v5 }
 0x164   :  { %v2291_v30 = vpop.f32.mrf.mxu1  ;;  %v2355_v62 = vpop.f32.mrf.mxu0 }
 0x165   :  { %v3752_v32 = vadd.f32 %v2353_v48, %v1591_v50  ;;  %v2292_v33 = vadd.f32 %v2291_v30, %v2290_v28  ;;  %v2356_v20 = vadd.f32 %v2355_v62, %v2354_v10 }
 0x166   :  { %v2293_v54 = vpop.f32.mrf.mxu1  ;;  %v2357_v37 = vpop.f32.mrf.mxu0 }
 0x167   :  { %v1594_v60 = vadd.f32 %v2292_v33, %v3707_v15 }
 0x168   :  { %v2294_v39 = vpop.f32.mrf.mxu1  ;;  %v2358_v9 = vpop.f32.mrf.mxu0 }
 0x169   :  { %v3755_v43 = vadd.f32 %v2356_v20, %v1594_v60  ;;  %v2295_v44 = vadd.f32 %v2294_v39, %v2293_v54  ;;  %v2359_v61 = vadd.f32 %v2358_v9, %v2357_v37 }
 0x16a   :  { %v2296_v45 = vpop.f32.mrf.mxu1  ;;  %v2360_v26 = vpop.f32.mrf.mxu0 }
 0x16b   :  { %v1599_v5 = vadd.f32 %v2295_v44, %v3710_v27 }
 0x16c   :  { %v2297_v47 = vpop.f32.mrf.mxu1  ;;  %v2361_v19 = vpop.f32.mrf.mxu0 }
 0x16d   :  { %v3758_v51 = vadd.f32 %v2359_v61, %v1599_v5  ;;  %v2298_v52 = vadd.f32 %v2297_v47, %v2296_v45  ;;  %v2362_v36 = vadd.f32 %v2361_v19, %v2360_v26 }
 0x16e   :  { %v2299_v12 = vpop.f32.mrf.mxu1  ;;  %v2363_v56 = vpop.f32.mrf.mxu0 }
 0x16f   :  { %v1602_v15 = vadd.f32 %v2298_v52, %v3713_v34 }
 0x170   :  { %v2300_v58 = vpop.f32.mrf.mxu1  ;;  %v2364_v25 = vpop.f32.mrf.mxu0 }
 0x171   :  { %v3761_v63 = vadd.f32 %v2362_v36, %v1602_v15  ;;  %v2301_v22 = vadd.f32 %v2300_v58, %v2299_v12  ;;  %v2365_v0 = vadd.f32 %v2364_v25, %v2363_v56 }
 0x172   :  { %v2302_v2 = vpop.f32.mrf.mxu1  ;;  %v2366_v42 = vpop.f32.mrf.mxu0 }
 0x173   :  { %v1607_v27 = vadd.f32 %v2301_v22, %v3716_v59 }
 0x174   :  { %v2303_v4 = vpop.f32.mrf.mxu1  ;;  %v2367_v35 = vpop.f32.mrf.mxu0 }
 0x175   :  { %v3764_v6 = vadd.f32 %v2365_v0, %v1607_v27  ;;  %v2304_v7 = vadd.f32 %v2303_v4, %v2302_v2  ;;  %v2368_v49 = vadd.f32 %v2367_v35, %v2366_v42 }
 0x176   :  { %v2305_v31 = vpop.f32.mrf.mxu1  ;;  %v2369_v11 = vpop.f32.mrf.mxu0 }
 0x177   :  { %v1610_v34 = vadd.f32 %v2304_v7, %v3719_v53 }
 0x178   :  { %v2306_v14 = vpop.f32.mrf.mxu1  ;;  %v2370_v41 = vpop.f32.mrf.mxu0 }
 0x179   :  { %v3767_v16 = vadd.f32 %v2368_v49, %v1610_v34  ;;  %v2307_v40 = vadd.f32 %v2306_v14, %v2305_v31  ;;  %v2371_v17 = vadd.f32 %v2370_v41, %v2369_v11 }
 0x17a   :  { %v2308_v21 = vpop.f32.mrf.mxu1  ;;  %v2372_v55 = vpop.f32.mrf.mxu0 }
 0x17b   :  { %v1615_v59 = vadd.f32 %v2307_v40, %v3722_v1 }
 0x17c   :  { %v2309_v24 = vpop.f32.mrf.mxu1  ;;  %v2373_v48 = vpop.f32.mrf.mxu0 }
 0x17d   :  { %v3770_v28 = vadd.f32 %v2371_v17, %v1615_v59  ;;  %v2310_v10 = vadd.f32 %v2309_v24, %v2308_v21  ;;  %v2374_v62 = vadd.f32 %v2373_v48, %v2372_v55 }
 0x17e   :  { %v2311_v50 = vpop.f32.mrf.mxu1  ;;  %v2375_v30 = vpop.f32.mrf.mxu0 }
 0x17f   :  { %v1618_v53 = vadd.f32 %v2310_v10, %v3725_v8 }
 0x180   :  { %v2312_v33 = vpop.f32.mrf.mxu1  ;;  %v2376_v54 = vpop.f32.mrf.mxu0 }
 0x181   :  { %v3773_v37 = vadd.f32 %v2374_v62, %v1618_v53  ;;  %v2313_v60 = vadd.f32 %v2312_v33, %v2311_v50  ;;  %v2377_v20 = vadd.f32 %v2376_v54, %v2375_v30 }
 0x182   :  { %v2314_v39 = vpop.f32.mrf.mxu1  ;;  %v2378_v9 = vpop.f32.mrf.mxu0 }
 0x183   :  { %v1623_v1 = vadd.f32 %v2313_v60, %v3728_v18 }
 0x184   :  { %v2315_v44 = vpop.f32.mrf.mxu1  ;;  %v2379_v61 = vpop.f32.mrf.mxu0 }
 0x185   :  { %v3776_v45 = vadd.f32 %v2377_v20, %v1623_v1  ;;  %v2316_v26 = vadd.f32 %v2315_v44, %v2314_v39  ;;  %v2380_v19 = vadd.f32 %v2379_v61, %v2378_v9 }
 0x186   :  { %v2397_v5 = vpop.f32.mrf.mxu1  ;;  %v1857_v47 = vpop.f32.mrf.mxu0 }
 0x187   :  { %v1626_v8 = vadd.f32 %v2316_v26, %v3731_v29 }
 0x188   :  { %v2398_v52 = vpop.f32.mrf.mxu1  ;;  %v1859_v12 = vpop.f32.mrf.mxu0 }
 0x189   :  { %v3779_v56 = vadd.f32 %v2380_v19, %v1626_v8  ;;  %v2399_v15 = vadd.f32 %v2398_v52, %v2397_v5 }
 0x18a   :  { %v2400_v36 = vpop.f32.mrf.mxu1  ;;  %v1860_v58 = vpop.f32.mrf.mxu0 }
 0x18b   :  { %v1761_v25 = vadd.f32 %v2399_v15, %v3734_v38 }
 0x18c   :  { %v2401_v18 = vpop.f32.mrf.mxu1  ;;  %v1862_v22 = vpop.f32.mrf.mxu0 }
 0x18d   :  { %v1858_v0 = vadd.f32 %v1857_v47, %v1761_v25  ;;  %v2402_v2 = vadd.f32 %v2401_v18, %v2400_v36 }
 0x18e   :  { %v2403_v42 = vpop.f32.mrf.mxu1  ;;  %v1865_v27 = vpop.f32.mrf.mxu0 }
 0x18f   :  { %1921 = vst.msk [vmem:[%s3863_s2] sm:$0xff] %vm1920_vm1, %v1858_v0  ;;  %v1764_v29 = vadd.f32 %v2402_v2, %v3737_v46 }
 0x190   :  { %v2404_v4 = vpop.f32.mrf.mxu1  ;;  %v1867_v35 = vpop.f32.mrf.mxu0 }
 0x191   :  { %v1861_v7 = vadd.f32 %v1860_v58, %v1764_v29  ;;  %v2405_v31 = vadd.f32 %v2404_v4, %v2403_v42 }
 0x192   :  { %v2406_v11 = vpop.f32.mrf.mxu1  ;;  %v1868_v38 = vpop.f32.mrf.mxu0 }
 0x193   :  { %1922 = vst.msk [vmem:[%s3863_s2 + $0x8] sm:$0xff] %vm1920_vm1, %v1861_v7  ;;  %v1769_v34 = vadd.f32 %v2405_v31, %v3740_v57 }
 0x194   :  { %v2407_v49 = vpop.f32.mrf.mxu1  ;;  %v1870_v14 = vpop.f32.mrf.mxu0 }
 0x195   :  { %v1866_v41 = vadd.f32 %v1865_v27, %v1769_v34  ;;  %v2408_v40 = vadd.f32 %v2407_v49, %v2406_v11 }
 0x196   :  { %v2409_v17 = vpop.f32.mrf.mxu1  ;;  %v1873_v21 = vpop.f32.mrf.mxu0 }
 0x197   :  { %1923 = vst.msk [vmem:[%s3863_s2 + $0x10] sm:$0xff] %vm1920_vm1, %v1866_v41  ;;  %v1772_v46 = vadd.f32 %v2408_v40, %v3743_v3 }
 0x198   :  { %v2410_v55 = vpop.f32.mrf.mxu1  ;;  %v1875_v59 = vpop.f32.mrf.mxu0 }
 0x199   :  { %v1869_v24 = vadd.f32 %v1868_v38, %v1772_v46  ;;  %v2411_v48 = vadd.f32 %v2410_v55, %v2409_v17 }
 0x19a   :  { %v2412_v10 = vpop.f32.mrf.mxu1  ;;  %v1876_v50 = vpop.f32.mrf.mxu0 }
 0x19b   :  { %1924 = vst.msk [vmem:[%s3863_s2 + $0x18] sm:$0xff] %vm1920_vm1, %v1869_v24  ;;  %v1777_v57 = vadd.f32 %v2411_v48, %v3746_v13 }
 0x19c   :  { %v2413_v30 = vpop.f32.mrf.mxu1  ;;  %v1878_v53 = vpop.f32.mrf.mxu0 }
 0x19d   :  { %v1874_v62 = vadd.f32 %v1873_v21, %v1777_v57  ;;  %v2414_v33 = vadd.f32 %v2413_v30, %v2412_v10 }
 0x19e   :  { %v2415_v54 = vpop.f32.mrf.mxu1  ;;  %v1881_v60 = vpop.f32.mrf.mxu0 }
 0x19f   :  { %1925 = vst.msk [vmem:[%s3863_s2 + $0x20] sm:$0xff] %vm1920_vm1, %v1874_v62  ;;  %v1780_v3 = vadd.f32 %v2414_v33, %v3749_v23 }
 0x1a0   :  { %v2416_v20 = vpop.f32.mrf.mxu1  ;;  %v1883_v39 = vpop.f32.mrf.mxu0 }
 0x1a1   :  { %v1877_v9 = vadd.f32 %v1876_v50, %v1780_v3  ;;  %v2417_v1 = vadd.f32 %v2416_v20, %v2415_v54 }
 0x1a2   :  { %v2418_v44 = vpop.f32.mrf.mxu1  ;;  %v1884_v61 = vpop.f32.mrf.mxu0 }
 0x1a3   :  { %1926 = vst.msk [vmem:[%s3863_s2 + $0x28] sm:$0xff] %vm1920_vm1, %v1877_v9  ;;  %v1785_v13 = vadd.f32 %v2417_v1, %v3752_v32 }
 0x1a4   :  { %v2419_v26 = vpop.f32.mrf.mxu1  ;;  %v1886_v5 = vpop.f32.mrf.mxu0 }
 0x1a5   :  { %v1882_v47 = vadd.f32 %v1881_v60, %v1785_v13  ;;  %v2420_v8 = vadd.f32 %v2419_v26, %v2418_v44 }
 0x1a6   :  { %v2421_v19 = vpop.f32.mrf.mxu1  ;;  %v1889_v52 = vpop.f32.mrf.mxu0 }
 0x1a7   :  { %1927 = vst.msk [vmem:[%s3863_s2 + $0x30] sm:$0xff] %vm1920_vm1, %v1882_v47  ;;  %v1788_v23 = vadd.f32 %v2420_v8, %v3755_v43 }
 0x1a8   :  { %v2422_v12 = vpop.f32.mrf.mxu1  ;;  %v1891_v15 = vpop.f32.mrf.mxu0 }
 0x1a9   :  { %v1885_v36 = vadd.f32 %v1884_v61, %v1788_v23  ;;  %v2423_v58 = vadd.f32 %v2422_v12, %v2421_v19 }
 0x1aa   :  { %v2424_v25 = vpop.f32.mrf.mxu1  ;;  %v1892_v18 = vpop.f32.mrf.mxu0 }
 0x1ab   :  { %1928 = vst.msk [vmem:[%s3863_s2 + $0x38] sm:$0xff] %vm1920_vm1, %v1885_v36  ;;  %v1793_v32 = vadd.f32 %v2423_v58, %v3758_v51 }
 0x1ac   :  { %v2425_v22 = vpop.f32.mrf.mxu1  ;;  %v1894_v0 = vpop.f32.mrf.mxu0 }
 0x1ad   :  { %v1890_v2 = vadd.f32 %v1889_v52, %v1793_v32  ;;  %v2426_v42 = vadd.f32 %v2425_v22, %v2424_v25 }
 0x1ae   :  { %v2427_v27 = vpop.f32.mrf.mxu1  ;;  %v1897_v29 = vpop.f32.mrf.mxu0 }
 0x1af   :  { %1929 = vst.msk [vmem:[%s3863_s2 + $0x40] sm:$0xff] %vm1920_vm1, %v1890_v2  ;;  %v1796_v43 = vadd.f32 %v2426_v42, %v3761_v63 }
 0x1b0   :  { %v2428_v4 = vpop.f32.mrf.mxu1  ;;  %v1899_v35 = vpop.f32.mrf.mxu0 }
 0x1b1   :  { %v1893_v7 = vadd.f32 %v1892_v18, %v1796_v43  ;;  %v2429_v31 = vadd.f32 %v2428_v4, %v2427_v27 }
 0x1b2   :  { %v2430_v11 = vpop.f32.mrf.mxu1  ;;  %v1900_v38 = vpop.f32.mrf.mxu0 }
 0x1b3   :  { %1930 = vst.msk [vmem:[%s3863_s2 + $0x48] sm:$0xff] %vm1920_vm1, %v1893_v7  ;;  %v1801_v51 = vadd.f32 %v2429_v31, %v3764_v6 }
 0x1b4   :  { %v2431_v34 = vpop.f32.mrf.mxu1  ;;  %v1902_v49 = vpop.f32.mrf.mxu0 }
 0x1b5   :  { %v1898_v14 = vadd.f32 %v1897_v29, %v1801_v51  ;;  %v2432_v41 = vadd.f32 %v2431_v34, %v2430_v11 }
 0x1b6   :  { %v2433_v40 = vpop.f32.mrf.mxu1  ;;  %v1905_v17 = vpop.f32.mrf.mxu0 }
 0x1b7   :  { %1931 = vst.msk [vmem:[%s3863_s2 + $0x50] sm:$0xff] %vm1920_vm1, %v1898_v14  ;;  %v1804_v63 = vadd.f32 %v2432_v41, %v3767_v16 }
 0x1b8   :  { %v2434_v21 = vpop.f32.mrf.mxu1  ;;  %v1907_v46 = vpop.f32.mrf.mxu0 }
 0x1b9   :  { %v1901_v55 = vadd.f32 %v1900_v38, %v1804_v63  ;;  %v2435_v59 = vadd.f32 %v2434_v21, %v2433_v40 }
 0x1ba   :  { %v2436_v24 = vpop.f32.mrf.mxu1  ;;  %v1908_v48 = vpop.f32.mrf.mxu0 }
 0x1bb   :  { %1932 = vst.msk [vmem:[%s3863_s2 + $0x58] sm:$0xff] %vm1920_vm1, %v1901_v55  ;;  %v1809_v6 = vadd.f32 %v2435_v59, %v3770_v28 }
 0x1bc   :  { %v2437_v10 = vpop.f32.mrf.mxu1  ;;  %v1910_v50 = vpop.f32.mrf.mxu0 }
 0x1bd   :  { %v1906_v57 = vadd.f32 %v1905_v17, %v1809_v6  ;;  %v2438_v30 = vadd.f32 %v2437_v10, %v2436_v24 }
 0x1be   :  { %v2439_v53 = vpop.f32.mrf.mxu1  ;;  %v1913_v62 = vpop.f32.mrf.mxu0 }
 0x1bf   :  { %1933 = vst.msk [vmem:[%s3863_s2 + $0x60] sm:$0xff] %vm1920_vm1, %v1906_v57  ;;  %v1812_v16 = vadd.f32 %v2438_v30, %v3773_v37 }
 0x1c0   :  { %v2440_v33 = vpop.f32.mrf.mxu1  ;;  %v1915_v54 = vpop.f32.mrf.mxu0 }
 0x1c1   :  { %v1909_v60 = vadd.f32 %v1908_v48, %v1812_v16  ;;  %v2441_v3 = vadd.f32 %v2440_v33, %v2439_v53 }
 0x1c2   :  { %v2442_v20 = vpop.f32.mrf.mxu1  ;;  %v1916_v39 = vpop.f32.mrf.mxu0 }
 0x1c3   :  { %1934 = vst.msk [vmem:[%s3863_s2 + $0x68] sm:$0xff] %vm1920_vm1, %v1909_v60  ;;  %v1817_v28 = vadd.f32 %v2441_v3, %v3776_v45 }
 0x1c4   :  { %v2443_v9 = vpop.f32.mrf.mxu1  ;;  %v1918_v1 = vpop.f32.mrf.mxu0 }
 0x1c5   :  { %v1914_v44 = vadd.f32 %v1913_v62, %v1817_v28  ;;  %v2444_v61 = vadd.f32 %v2443_v9, %v2442_v20 }
 0x1c7   :  { %1935 = vst.msk [vmem:[%s3863_s2 + $0x70] sm:$0xff] %vm1920_vm1, %v1914_v44  ;;  %v1820_v37 = vadd.f32 %v2444_v61, %v3779_v56 }
 0x1c9   :  { %v1917_v13 = vadd.f32 %v1916_v39, %v1820_v37 }
 0x1cb   :  { %1936 = vst.msk [vmem:[%s3863_s2 + $0x78] sm:$0xff] %vm1920_vm1, %v1917_v13 }

</bundles_post_ra>
